<compile_context>
chip_gen: v5e
topology: v5e:2x2
jax: 0.10.0
libtpu: 0.0.40
codegen_flags: <defaults>
</compile_context>

<pallas_src>
import functools

import jax
import jax.numpy as jnp
import numpy as np
from jax.experimental import pallas as pl
from jax.experimental.pallas import tpu as pltpu


def repconv_kernel(slope_ref, x_ref, w_ref, b_ref, out_ref, xpad_ref,
                   *, H, W, K, P):
    """Fused (reparameterized) RepConv forward for one batch element.

    slope_ref : SMEM (1,)               PReLU negative slope = 1 - relu_alpha
    x_ref     : VMEM (1, H, W, C1)      unpadded NHWC input tile
    w_ref     : VMEM (K*K, C1, Cp)      folded conv weight (Cp = C2 padded to 128)
    b_ref     : VMEM (1, Cp)            folded bias
    out_ref   : VMEM (1, H*W, Cp)       lane-dense output
    xpad_ref  : VMEM (H+2P, W+2P, C1)   scratch: zero-padded halo tile
    """
    C1 = x_ref.shape[-1]
    Cp = out_ref.shape[-1]

    # Build the zero-padded tile in VMEM (halo handled in-kernel, no HBM
    # round trip for padding).  Zeroed every step -> correct under megacore
    # grid sharding; the tile is only a few KiB so this is negligible.
    xpad_ref[...] = jnp.zeros_like(xpad_ref)
    xpad_ref[P:P + H, P:P + W, :] = x_ref[0]

    # Start the f32 accumulator from the folded bias (saves an add pass).
    acc = jnp.broadcast_to(b_ref[...], (H * W, Cp)).astype(jnp.float32)

    # Shifted-accumulate convolution: K*K small MXU matmuls accumulated in
    # f32.  Only one (H*W, C1) shifted view is live at a time (no im2col).
    for dy in range(K):
        for dx in range(K):
            xs = xpad_ref[dy:dy + H, dx:dx + W, :].reshape(H * W, C1)
            acc = acc + jnp.dot(xs, w_ref[dy * K + dx],
                                preferred_element_type=jnp.float32)

    # RepReLU == PReLU with a single scalar negative slope, applied once on
    # the f32 accumulator — lane-dense since Cp is a multiple of 128.
    slope = slope_ref[0]
    y = jnp.where(acc >= 0, acc, slope * acc)
    out_ref[0] = y.astype(out_ref.dtype)


def repconv_forward(x_nchw, w_kxk, w_1x1, bn1, bn2,
                    conv_alpha, relu_alpha, k, stride=1):
    """Full RepConv.forward.  x_nchw: (N, C1, H, W) float32.  Returns NCHW."""
    assert stride == 1, "only stride=1 implemented"
    N, C1, H, W = x_nchw.shape
    C2 = w_kxk.shape[0]
    P = k // 2
    Cp = ((C2 + 127) // 128) * 128          # pad output channels to lane width

    # ---- Reparameterize: fold both conv branches + eval-mode BN into one
    # ---- weight / bias (done once in XLA on tiny arrays).
    eps = 1e-5

    def fold(bn):
        g, b, m, v = bn
        s = g / jnp.sqrt(v + eps)
        return s, b - m * s

    s1, b1 = fold(bn1)
    s2, b2 = fold(bn2)

    a = jnp.float32(conv_alpha)
    wf = a * s1[:, None, None, None] * w_kxk                        # (C2,C1,K,K)
    wf = wf.at[:, :, P, P].add((1.0 - a) * s2[:, None] * w_1x1[:, :, 0, 0])
    bf = a * b1 + (1.0 - a) * b2                                    # (C2,)

    # OIHW -> (K*K, C1, Cp), (dy, dx) ordering matching the kernel's loop.
    wk = jnp.transpose(wf, (2, 3, 1, 0)).reshape(k * k, C1, C2)
    wk = jnp.pad(wk, ((0, 0), (0, 0), (0, Cp - C2))).astype(jnp.float32)
    bk = jnp.pad(bf, (0, Cp - C2)).reshape(1, Cp).astype(jnp.float32)
    slope = jnp.asarray([1.0 - relu_alpha], dtype=jnp.float32)

    # NCHW -> NHWC; padding is done inside the kernel (VMEM halo scratch).
    x = jnp.transpose(x_nchw, (0, 2, 3, 1))
    Hp, Wp = H + 2 * P, W + 2 * P

    # Explicit VMEM budget: double-buffered input+output tiles, weights, bias
    # and the halo scratch.
    tile_bytes = (2 * H * W * C1 + 2 * H * W * Cp
                  + k * k * C1 * Cp + Cp + Hp * Wp * C1) * 4
    vmem_limit = int(min(max(2 * tile_bytes, 8 << 20), 64 << 20))

    kernel = functools.partial(repconv_kernel, H=H, W=W, K=k, P=P)
    out = pl.pallas_call(
        kernel,
        out_shape=jax.ShapeDtypeStruct((N, H * W, Cp), x.dtype),
        grid=(N,),
        in_specs=[
            pl.BlockSpec(memory_space=pltpu.MemorySpace.SMEM),       # slope
            pl.BlockSpec((1, H, W, C1), lambda n: (n, 0, 0, 0)),     # x (unpadded)
            pl.BlockSpec((k * k, C1, Cp), lambda n: (0, 0, 0)),      # folded W
            pl.BlockSpec((1, Cp), lambda n: (0, 0)),                 # folded b
        ],
        out_specs=pl.BlockSpec((1, H * W, Cp), lambda n: (n, 0, 0)),
        scratch_shapes=[pltpu.VMEM((Hp, Wp, C1), jnp.float32)],      # halo tile
        compiler_params=pltpu.CompilerParams(
            dimension_semantics=("parallel",),
            vmem_limit_bytes=vmem_limit),
    )(slope, x, wk, bk)

    # Drop channel padding, restore (N, C2, H, W).
    out = out[:, :, :C2].reshape(N, H, W, C2)
    return jnp.transpose(out, (0, 3, 1, 2))


def repconv_reference(x_nchw, w_kxk, w_1x1, bn1, bn2,
                      conv_alpha, relu_alpha, k):
    """Pure-JAX reference matching the PyTorch forward (eval-mode BN)."""
    P = k // 2
    dn = ('NCHW', 'OIHW', 'NCHW')
    y1 = jax.lax.conv_general_dilated(x_nchw, w_kxk, (1, 1),
                                      ((P, P), (P, P)), dimension_numbers=dn)
    y2 = jax.lax.conv_general_dilated(x_nchw, w_1x1, (1, 1),
                                      ((0, 0), (0, 0)), dimension_numbers=dn)
    eps = 1e-5

    def bn(y, p):
        g, b, m, v = p
        return (g[None, :, None, None] * (y - m[None, :, None, None])
                / jnp.sqrt(v[None, :, None, None] + eps)
                + b[None, :, None, None])

    y1 = bn(y1, bn1)
    y2 = bn(y2, bn2)
    y = conv_alpha * y1 + (1.0 - conv_alpha) * y2
    slope = 1.0 - relu_alpha
    return jnp.where(y >= 0, y, slope * y)


if __name__ == "__main__":
    # RepConv(c1=4, c2=8, k=3, s=1, g=1, act=True) on x of shape (2, 4, 16, 16)
    N, C1, C2, H, W, K = 2, 4, 8, 16, 16, 3

    key = jax.random.PRNGKey(0)
    (k_w, k_g1, k_b1, k_m1, k_v1,
     k_g2, k_b2, k_m2, k_v2, k_x) = jax.random.split(key, 10)

    # kxk conv weight (OIHW), no bias.
    w_kxk = 0.3 * jax.random.normal(k_w, (C2, C1, K, K), dtype=jnp.float32)

    # 1x1 conv weight: identity-like init as in the module __init__.
    identity_mat = np.eye(max(C1, C2), dtype=np.float32) + 1e-6
    w_1x1 = jnp.asarray(identity_mat[:C2, :C1, None, None])

    # BatchNorm parameters (gamma, beta, running_mean, running_var), eval-mode.
    bn1 = (0.5 + jax.random.uniform(k_g1, (C2,), dtype=jnp.float32),
           0.1 * jax.random.normal(k_b1, (C2,), dtype=jnp.float32),
           0.1 * jax.random.normal(k_m1, (C2,), dtype=jnp.float32),
           0.5 + jax.random.uniform(k_v1, (C2,), dtype=jnp.float32))
    bn2 = (0.5 + jax.random.uniform(k_g2, (C2,), dtype=jnp.float32),
           0.1 * jax.random.normal(k_b2, (C2,), dtype=jnp.float32),
           0.1 * jax.random.normal(k_m2, (C2,), dtype=jnp.float32),
           0.5 + jax.random.uniform(k_v2, (C2,), dtype=jnp.float32))

    # Learnable blend scalars (module inits both to 1.0; use non-trivial
    # values so both branches and the PReLU slope are exercised).
    conv_alpha = 0.75
    relu_alpha = 0.80

    x = jax.random.normal(k_x, (N, C1, H, W), dtype=jnp.float32)

    out = repconv_forward(x, w_kxk, w_1x1, bn1, bn2, conv_alpha, relu_alpha, K)
    out = jax.block_until_ready(out)

    ref = repconv_reference(x, w_kxk, w_1x1, bn1, bn2, conv_alpha, relu_alpha, K)
    ref = jax.block_until_ready(ref)

    assert out.shape == (N, C2, H, W), out.shape
    np.testing.assert_allclose(np.asarray(out), np.asarray(ref),
                               rtol=1e-2, atol=1e-2)
    print("KERNEL_OK")
</pallas_src>

<mosaic_0001>
module attributes {stable_mosaic.version = 11 : i64} {
  func.func @repconv_kernel(%arg0: i32, %arg1: memref<1xf32, #tpu.memory_space<smem>>, %arg2: memref<1x16x16x4xf32, #tpu.memory_space<vmem>>, %arg3: memref<9x4x128xf32, #tpu.memory_space<vmem>>, %arg4: memref<1x128xf32, #tpu.memory_space<vmem>>, %arg5: memref<1x256x128xf32, #tpu.memory_space<vmem>>, %arg6: memref<18x18x4xf32, #tpu.memory_space<vmem>>) attributes {dimension_semantics = [#tpu.dimension_semantics<parallel>], iteration_bounds = array<i64: 2>, scalar_prefetch = 0 : i64, scratch_operands = 1 : i64, tpu.core_type = #tpu.core_type<tc>, window_params = [{transform_indices = @transform_0, window_bounds = array<i64: 1>}, {transform_indices = @transform_1, window_bounds = array<i64: 1, 16, 16, 4>}, {pipeline_mode = #tpu.pipeline_mode<synchronous>, transform_indices = @transform_2, window_bounds = array<i64: 9, 4, 128>}, {pipeline_mode = #tpu.pipeline_mode<synchronous>, transform_indices = @transform_3, window_bounds = array<i64: 1, 128>}, {transform_indices = @transform_4, window_bounds = array<i64: 1, 256, 128>}]} {
    %cst = arith.constant 0.000000e+00 : f32
    %0 = vector.broadcast %cst : f32 to vector<18x18x4xf32>
    %c0 = arith.constant 0 : index
    %c0_0 = arith.constant 0 : index
    %c0_1 = arith.constant 0 : index
    %1 = vector.load %arg6[%c0, %c0_0, %c0_1] : memref<18x18x4xf32, #tpu.memory_space<vmem>>, vector<18x18x4xf32>
    tpu.vector_store %arg6[%c0, %c0_0, %c0_1], %0 {strides = array<i32>} : memref<18x18x4xf32, #tpu.memory_space<vmem>>, vector<18x18x4xf32>,
    %c0_2 = arith.constant 0 : index
    %c0_3 = arith.constant 0 : index
    %c0_4 = arith.constant 0 : index
    %c0_5 = arith.constant 0 : index
    %2 = vector.load %arg2[%c0_2, %c0_3, %c0_4, %c0_5] : memref<1x16x16x4xf32, #tpu.memory_space<vmem>>, vector<1x16x16x4xf32>
    %3 = vector.shape_cast %2 : vector<1x16x16x4xf32> to vector<16x16x4xf32>
    %c1 = arith.constant 1 : index
    %c1_6 = arith.constant 1 : index
    %c0_7 = arith.constant 0 : index
    %4 = vector.load %arg6[%c1, %c1_6, %c0_7] : memref<18x18x4xf32, #tpu.memory_space<vmem>>, vector<16x16x4xf32>
    tpu.vector_store %arg6[%c1, %c1_6, %c0_7], %3 {strides = array<i32>} : memref<18x18x4xf32, #tpu.memory_space<vmem>>, vector<16x16x4xf32>,
    %c0_8 = arith.constant 0 : index
    %c0_9 = arith.constant 0 : index
    %5 = vector.load %arg4[%c0_8, %c0_9] : memref<1x128xf32, #tpu.memory_space<vmem>>, vector<1x128xf32>
    %6 = vector.shape_cast %5 : vector<1x128xf32> to vector<1x128xf32>
    %7 = vector.broadcast %6 : vector<1x128xf32> to vector<256x128xf32>
    %c0_10 = arith.constant 0 : index
    %c0_11 = arith.constant 0 : index
    %c0_12 = arith.constant 0 : index
    %8 = vector.load %arg6[%c0_10, %c0_11, %c0_12] : memref<18x18x4xf32, #tpu.memory_space<vmem>>, vector<16x16x4xf32>
    %9 = vector.shape_cast %8 : vector<16x16x4xf32> to vector<256x4xf32>
    %c0_13 = arith.constant 0 : index
    %c0_14 = arith.constant 0 : index
    %c0_15 = arith.constant 0 : index
    %10 = vector.load %arg3[%c0_13, %c0_14, %c0_15] : memref<9x4x128xf32, #tpu.memory_space<vmem>>, vector<1x4x128xf32>
    %11 = vector.shape_cast %10 : vector<1x4x128xf32> to vector<4x128xf32>
    %cst_16 = arith.constant dense<0.000000e+00> : vector<256x128xf32>
    %12 = tpu.matmul %9, %11, %cst_16 {dimension_numbers = #tpu.dot_dimension_numbers<[1], [0], [0], [1], [0, 0, 1, 1], [], []>} : vector<256x4xf32>, vector<4x128xf32>, vector<256x128xf32> -> vector<256x128xf32>
    %13 = arith.addf %7, %12 : vector<256x128xf32>
    %c0_17 = arith.constant 0 : index
    %c1_18 = arith.constant 1 : index
    %c0_19 = arith.constant 0 : index
    %14 = vector.load %arg6[%c0_17, %c1_18, %c0_19] : memref<18x18x4xf32, #tpu.memory_space<vmem>>, vector<16x16x4xf32>
    %15 = vector.shape_cast %14 : vector<16x16x4xf32> to vector<256x4xf32>
    %c1_20 = arith.constant 1 : index
    %c0_21 = arith.constant 0 : index
    %c0_22 = arith.constant 0 : index
    %16 = vector.load %arg3[%c1_20, %c0_21, %c0_22] : memref<9x4x128xf32, #tpu.memory_space<vmem>>, vector<1x4x128xf32>
    %17 = vector.shape_cast %16 : vector<1x4x128xf32> to vector<4x128xf32>
    %cst_23 = arith.constant dense<0.000000e+00> : vector<256x128xf32>
    %18 = tpu.matmul %15, %17, %cst_23 {dimension_numbers = #tpu.dot_dimension_numbers<[1], [0], [0], [1], [0, 0, 1, 1], [], []>} : vector<256x4xf32>, vector<4x128xf32>, vector<256x128xf32> -> vector<256x128xf32>
    %19 = arith.addf %13, %18 : vector<256x128xf32>
    %c0_24 = arith.constant 0 : index
    %c2 = arith.constant 2 : index
    %c0_25 = arith.constant 0 : index
    %20 = vector.load %arg6[%c0_24, %c2, %c0_25] : memref<18x18x4xf32, #tpu.memory_space<vmem>>, vector<16x16x4xf32>
    %21 = vector.shape_cast %20 : vector<16x16x4xf32> to vector<256x4xf32>
    %c2_26 = arith.constant 2 : index
    %c0_27 = arith.constant 0 : index
    %c0_28 = arith.constant 0 : index
    %22 = vector.load %arg3[%c2_26, %c0_27, %c0_28] : memref<9x4x128xf32, #tpu.memory_space<vmem>>, vector<1x4x128xf32>
    %23 = vector.shape_cast %22 : vector<1x4x128xf32> to vector<4x128xf32>
    %cst_29 = arith.constant dense<0.000000e+00> : vector<256x128xf32>
    %24 = tpu.matmul %21, %23, %cst_29 {dimension_numbers = #tpu.dot_dimension_numbers<[1], [0], [0], [1], [0, 0, 1, 1], [], []>} : vector<256x4xf32>, vector<4x128xf32>, vector<256x128xf32> -> vector<256x128xf32>
    %25 = arith.addf %19, %24 : vector<256x128xf32>
    %c1_30 = arith.constant 1 : index
    %c0_31 = arith.constant 0 : index
    %c0_32 = arith.constant 0 : index
    %26 = vector.load %arg6[%c1_30, %c0_31, %c0_32] : memref<18x18x4xf32, #tpu.memory_space<vmem>>, vector<16x16x4xf32>
    %27 = vector.shape_cast %26 : vector<16x16x4xf32> to vector<256x4xf32>
    %c3 = arith.constant 3 : index
    %c0_33 = arith.constant 0 : index
    %c0_34 = arith.constant 0 : index
    %28 = vector.load %arg3[%c3, %c0_33, %c0_34] : memref<9x4x128xf32, #tpu.memory_space<vmem>>, vector<1x4x128xf32>
    %29 = vector.shape_cast %28 : vector<1x4x128xf32> to vector<4x128xf32>
    %cst_35 = arith.constant dense<0.000000e+00> : vector<256x128xf32>
    %30 = tpu.matmul %27, %29, %cst_35 {dimension_numbers = #tpu.dot_dimension_numbers<[1], [0], [0], [1], [0, 0, 1, 1], [], []>} : vector<256x4xf32>, vector<4x128xf32>, vector<256x128xf32> -> vector<256x128xf32>
    %31 = arith.addf %25, %30 : vector<256x128xf32>
    %c1_36 = arith.constant 1 : index
    %c1_37 = arith.constant 1 : index
    %c0_38 = arith.constant 0 : index
    %32 = vector.load %arg6[%c1_36, %c1_37, %c0_38] : memref<18x18x4xf32, #tpu.memory_space<vmem>>, vector<16x16x4xf32>
    %33 = vector.shape_cast %32 : vector<16x16x4xf32> to vector<256x4xf32>
    %c4 = arith.constant 4 : index
    %c0_39 = arith.constant 0 : index
    %c0_40 = arith.constant 0 : index
    %34 = vector.load %arg3[%c4, %c0_39, %c0_40] : memref<9x4x128xf32, #tpu.memory_space<vmem>>, vector<1x4x128xf32>
    %35 = vector.shape_cast %34 : vector<1x4x128xf32> to vector<4x128xf32>
    %cst_41 = arith.constant dense<0.000000e+00> : vector<256x128xf32>
    %36 = tpu.matmul %33, %35, %cst_41 {dimension_numbers = #tpu.dot_dimension_numbers<[1], [0], [0], [1], [0, 0, 1, 1], [], []>} : vector<256x4xf32>, vector<4x128xf32>, vector<256x128xf32> -> vector<256x128xf32>
    %37 = arith.addf %31, %36 : vector<256x128xf32>
    %c1_42 = arith.constant 1 : index
    %c2_43 = arith.constant 2 : index
    %c0_44 = arith.constant 0 : index
    %38 = vector.load %arg6[%c1_42, %c2_43, %c0_44] : memref<18x18x4xf32, #tpu.memory_space<vmem>>, vector<16x16x4xf32>
    %39 = vector.shape_cast %38 : vector<16x16x4xf32> to vector<256x4xf32>
    %c5 = arith.constant 5 : index
    %c0_45 = arith.constant 0 : index
    %c0_46 = arith.constant 0 : index
    %40 = vector.load %arg3[%c5, %c0_45, %c0_46] : memref<9x4x128xf32, #tpu.memory_space<vmem>>, vector<1x4x128xf32>
    %41 = vector.shape_cast %40 : vector<1x4x128xf32> to vector<4x128xf32>
    %cst_47 = arith.constant dense<0.000000e+00> : vector<256x128xf32>
    %42 = tpu.matmul %39, %41, %cst_47 {dimension_numbers = #tpu.dot_dimension_numbers<[1], [0], [0], [1], [0, 0, 1, 1], [], []>} : vector<256x4xf32>, vector<4x128xf32>, vector<256x128xf32> -> vector<256x128xf32>
    %43 = arith.addf %37, %42 : vector<256x128xf32>
    %c2_48 = arith.constant 2 : index
    %c0_49 = arith.constant 0 : index
    %c0_50 = arith.constant 0 : index
    %44 = vector.load %arg6[%c2_48, %c0_49, %c0_50] : memref<18x18x4xf32, #tpu.memory_space<vmem>>, vector<16x16x4xf32>
    %45 = vector.shape_cast %44 : vector<16x16x4xf32> to vector<256x4xf32>
    %c6 = arith.constant 6 : index
    %c0_51 = arith.constant 0 : index
    %c0_52 = arith.constant 0 : index
    %46 = vector.load %arg3[%c6, %c0_51, %c0_52] : memref<9x4x128xf32, #tpu.memory_space<vmem>>, vector<1x4x128xf32>
    %47 = vector.shape_cast %46 : vector<1x4x128xf32> to vector<4x128xf32>
    %cst_53 = arith.constant dense<0.000000e+00> : vector<256x128xf32>
    %48 = tpu.matmul %45, %47, %cst_53 {dimension_numbers = #tpu.dot_dimension_numbers<[1], [0], [0], [1], [0, 0, 1, 1], [], []>} : vector<256x4xf32>, vector<4x128xf32>, vector<256x128xf32> -> vector<256x128xf32>
    %49 = arith.addf %43, %48 : vector<256x128xf32>
    %c2_54 = arith.constant 2 : index
    %c1_55 = arith.constant 1 : index
    %c0_56 = arith.constant 0 : index
    %50 = vector.load %arg6[%c2_54, %c1_55, %c0_56] : memref<18x18x4xf32, #tpu.memory_space<vmem>>, vector<16x16x4xf32>
    %51 = vector.shape_cast %50 : vector<16x16x4xf32> to vector<256x4xf32>
    %c7 = arith.constant 7 : index
    %c0_57 = arith.constant 0 : index
    %c0_58 = arith.constant 0 : index
    %52 = vector.load %arg3[%c7, %c0_57, %c0_58] : memref<9x4x128xf32, #tpu.memory_space<vmem>>, vector<1x4x128xf32>
    %53 = vector.shape_cast %52 : vector<1x4x128xf32> to vector<4x128xf32>
    %cst_59 = arith.constant dense<0.000000e+00> : vector<256x128xf32>
    %54 = tpu.matmul %51, %53, %cst_59 {dimension_numbers = #tpu.dot_dimension_numbers<[1], [0], [0], [1], [0, 0, 1, 1], [], []>} : vector<256x4xf32>, vector<4x128xf32>, vector<256x128xf32> -> vector<256x128xf32>
    %55 = arith.addf %49, %54 : vector<256x128xf32>
    %c2_60 = arith.constant 2 : index
    %c2_61 = arith.constant 2 : index
    %c0_62 = arith.constant 0 : index
    %56 = vector.load %arg6[%c2_60, %c2_61, %c0_62] : memref<18x18x4xf32, #tpu.memory_space<vmem>>, vector<16x16x4xf32>
    %57 = vector.shape_cast %56 : vector<16x16x4xf32> to vector<256x4xf32>
    %c8 = arith.constant 8 : index
    %c0_63 = arith.constant 0 : index
    %c0_64 = arith.constant 0 : index
    %58 = vector.load %arg3[%c8, %c0_63, %c0_64] : memref<9x4x128xf32, #tpu.memory_space<vmem>>, vector<1x4x128xf32>
    %59 = vector.shape_cast %58 : vector<1x4x128xf32> to vector<4x128xf32>
    %cst_65 = arith.constant dense<0.000000e+00> : vector<256x128xf32>
    %60 = tpu.matmul %57, %59, %cst_65 {dimension_numbers = #tpu.dot_dimension_numbers<[1], [0], [0], [1], [0, 0, 1, 1], [], []>} : vector<256x4xf32>, vector<4x128xf32>, vector<256x128xf32> -> vector<256x128xf32>
    %61 = arith.addf %55, %60 : vector<256x128xf32>
    %c0_66 = arith.constant 0 : index
    %62 = memref.load %arg1[%c0_66] : memref<1xf32, #tpu.memory_space<smem>>
    %cst_67 = arith.constant 0.000000e+00 : f32
    %63 = vector.broadcast %cst_67 : f32 to vector<256x128xf32>
    %64 = arith.cmpf oge, %61, %63 : vector<256x128xf32>
    %65 = vector.broadcast %62 : f32 to vector<256x128xf32>
    %66 = arith.mulf %65, %61 : vector<256x128xf32>
    %67 = arith.select %64, %61, %66 : vector<256x128xi1>, vector<256x128xf32>
    %c0_68 = arith.constant 0 : index
    %c0_69 = arith.constant 0 : index
    %c0_70 = arith.constant 0 : index
    %68 = vector.load %arg5[%c0_68, %c0_69, %c0_70] : memref<1x256x128xf32, #tpu.memory_space<vmem>>, vector<1x256x128xf32>
    %69 = vector.shape_cast %68 : vector<1x256x128xf32> to vector<256x128xf32>
    %70 = vector.shape_cast %67 : vector<256x128xf32> to vector<1x256x128xf32>
    tpu.vector_store %arg5[%c0_68, %c0_69, %c0_70], %70 {strides = array<i32>} : memref<1x256x128xf32, #tpu.memory_space<vmem>>, vector<1x256x128xf32>,
    return
  }
  func.func @transform_0(%arg0: i32) -> i32 {
    %c0_i32 = arith.constant 0 : i32
    %c0_i32_0 = arith.constant 0 : i32
    return %c0_i32 : i32
  }
  func.func @transform_1(%arg0: i32) -> (i32, i32, i32, i32) {
    %c0_i32 = arith.constant 0 : i32
    %c0_i32_0 = arith.constant 0 : i32
    %c0_i32_1 = arith.constant 0 : i32
    %c0_i32_2 = arith.constant 0 : i32
    return %arg0, %c0_i32, %c0_i32_0, %c0_i32_1 : i32, i32, i32, i32
  }
  func.func @transform_2(%arg0: i32) -> (i32, i32, i32) {
    %c0_i32 = arith.constant 0 : i32
    %c0_i32_0 = arith.constant 0 : i32
    %c0_i32_1 = arith.constant 0 : i32
    %c0_i32_2 = arith.constant 0 : i32
    return %c0_i32, %c0_i32_0, %c0_i32_1 : i32, i32, i32
  }
  func.func @transform_3(%arg0: i32) -> (i32, i32) {
    %c0_i32 = arith.constant 0 : i32
    %c0_i32_0 = arith.constant 0 : i32
    %c0_i32_1 = arith.constant 0 : i32
    return %c0_i32, %c0_i32_0 : i32, i32
  }
  func.func @transform_4(%arg0: i32) -> (i32, i32, i32) {
    %c0_i32 = arith.constant 0 : i32
    %c0_i32_0 = arith.constant 0 : i32
    %c0_i32_1 = arith.constant 0 : i32
    return %arg0, %c0_i32, %c0_i32_0 : i32, i32, i32
  }
}

</mosaic_0001>

<bundles_post_ra>
// kernel: tpu_custom_call.1
= control target key start
LH: loop header
LB: loop body
LE: loop exit
PB: predicated region body
PF: predicated region fallthrough
CT: control target
= control target key end

     0   :  { %s4765_s0 = inlined_call_operand.<no memory space> [shape: f32[1], index: 0, kind: input, shape index: {}]   ;;  %s4766_s1 = inlined_call_operand.vmem [shape: f32[2,16,16,4], index: 1, kind: input, shape index: {}]   ;;  %s4767_s2 = inlined_call_operand.vmem [shape: f32[9,4,128], index: 2, kind: input, shape index: {}]   ;;  %s4768_s3 = inlined_call_operand.vmem [shape: f32[1,128], index: 3, kind: input, shape index: {}]   ;;  %s4769_s4 = inlined_call_operand.hbm [shape: f32[2,256,128], index: 4, kind: output, shape index: {}]  }
   0x1   :  { %9 = sst [smem:[#allocation3]] %s4765_s0 }
   0x2   :  { %10 = vsyncpa [#allocation5], 0 }
   0x3   :  { %12 = vsyncpa [#allocation5 + $0x1], 0  ;;  %s3493_s17 = smov 0   ;;  %s3495_s18 = smov 0  }
   0x4   :  { %s3497_s19 = smov 0   ;;  %s3499_s20 = smov 0  }
   0x5 LB: > { %s3514_s0 = sadd.s32 4294967295, %s3460_s20   ;;  %s3033_s21 = sadd.s32 4294967294, %s3460_s20   ;;  %s3460_s20 = sphi %s3499_s20, %s4896_s20   ;;  %s3456_s19 = sphi %s3497_s19, %s4895_s19   ;;  %s3452_s18 = sphi %s3495_s18, %s4894_s18   ;;  %s3448_s17 = sphi %s3493_s17, %s4893_s17  }
   0x6   : > { %s3518_s22 = sadd.s32 1, %s3460_s20   ;;  %s114_s23 = sadd.s32 1, %s3456_s19 }
   0x7   : > { %s111_s24 = ssub.s32 %s3460_s20, %s3518_s22  ;;  %p124_p0 = scmp.ne.s32.totalorder %s3456_s19, %s3452_s18 }
   0x8   : > { %p112_p1 = scmp.eq.s32.totalorder %s111_s24, 0  ;;  %p125_p2 = scmp.eq.s32.totalorder %s3514_s0, 1 }
   0x9   : > { %p130_p3 = scmp.ne.s32.totalorder %s3452_s18, %s3448_s17  ;;  %p131_p4 = scmp.eq.s32.totalorder %s3033_s21, 1 }
   0xa   : > { %s3529_s25 = scalar_select %p112_p1, %s3456_s19, %s114_s23  }
   0xb   : > { %p3531_p5 = por %p125_p2, %p124_p0  ;;  %p3535_p6 = por %p131_p4, %p130_p3 }
   0xc   : > { %p3036_p7 = scmp.ge.s32.totalorder %s3460_s20, 1  ;;  %p166_p8 = scmp.lt.s32.totalorder %s3460_s20, 3 }
   0xe   : > { %p167_p9 = pnand %p3036_p7, %p166_p8 }
  0x10   : > { %170 = sbr.rel (%p167_p9) target bundleno = 793 (0x319), region = 36 }
  0x15   : > { %v354_v0 = vld [vmem:[%s4767_s2] sm:$0xf]  ;;  %vm451_vm0 = vcmask 1043456   ;;  %p192_p10 = scmp.lt.s32.totalorder %s3514_s0, 1  ;;  %vm197_vm1 = vcmask 31744   ;;  %v3462_v1 = vmov 0.0  }
  0x16   : > { %3352 = vmatpush.msk.msra.mxu1 %vm451_vm0, %v354_v0  ;;  %3353 = vmatpush.msk.msra.mxu2 %vm451_vm0, %v354_v0  ;;  %211 = vst.msk [vmem:[#allocation2 + $0x60] sm:$0xff] %vm197_vm1, %v3462_v1  ;;  %v3107_v4 = vld [vmem:[%s4767_s2 + $0x8] sm:$0xf]  ;;  %v3141_v5 = vld [vmem:[%s4767_s2 + $0xc] sm:$0xf]  ;;  %vm200_vm2 = vcmask 25600  }
  0x17   : > { %s193_s30 = scalar_select %p192_p10, %s3514_s0, 1  ;;  %212 = vst.msk [vmem:[#allocation2 + $0x68] sm:$0xff] %vm197_vm1, %v3462_v1  ;;  %3354 = vmatpush.msk.msra.mxu3 %vm451_vm0, %v354_v0  ;;  %3040 = vmatpush.msk.msra.mxu0 %vm451_vm0, %v354_v0  ;;  %v3073_v6 = vld [vmem:[%s4767_s2 + $0x4] sm:$0xf]  ;;  %v3175_v10 = vld [vmem:[%s4767_s2 + $0x10] sm:$0xf] }
  0x18   : > { %198 = vst.msk [vmem:[#allocation2] sm:$0xff] %vm197_vm1, %v3462_v1  ;;  %3108 = vmatpush.msk.msrb.mxu2 %vm451_vm0, %v3107_v4  ;;  %3074 = vmatpush.msk.msrb.mxu1 %vm451_vm0, %v3073_v6  ;;  %v3243_v57 = vld [vmem:[%s4767_s2 + $0x18] sm:$0xf]  ;;  %v3277_v58 = vld [vmem:[%s4767_s2 + $0x1c] sm:$0xf]  ;;  %s189_s10 = sand.u32 1, %s3452_s18  }
  0x19   : > { %s3350_s5 = sshll.u32 %s193_s30, 8  ;;  %199 = vst.msk [vmem:[#allocation2 + $0x8] sm:$0xff] %vm197_vm1, %v3462_v1  ;;  %3142 = vmatpush.msk.msrb.mxu3 %vm451_vm0, %v3141_v5  ;;  %3176 = vmatpush.msk.msrb.mxu0 %vm451_vm0, %v3175_v10  ;;  %v3209_v59 = vld [vmem:[%s4767_s2 + $0x14] sm:$0xf]  ;;  %v3311_v0 = vld [vmem:[%s4767_s2 + $0x20] sm:$0xf] }
  0x1a   : > { %s3561_s8 = scalar_lea.vmem %s4766_s1, %s3350_s5  ;;  %202 = vst.msk [vmem:[#allocation2 + $0x18] sm:$0xff] %vm197_vm1, %v3462_v1  ;;  %s3037_s11 = sshll.u32 %s189_s10, 8 }
  0x1b   : > { %v259_v2 = vld [vmem:[%s3561_s8 + $0x30] sm:$0xff]  ;;  %203 = vst.msk [vmem:[#allocation2 + $0x20] sm:$0xff] %vm197_vm1, %v3462_v1  ;;  %v260_v11 = vld [vmem:[%s3561_s8 + $0x38] sm:$0xff]  ;;  %v261_v18 = vld [vmem:[%s3561_s8 + $0x40] sm:$0xff]  ;;  %s4562_s12 = scalar_lea.vmem [#allocation4], %s3037_s11  ;;  %s3351_s13 = sshll.u32 %s3514_s0, 8 }
  0x1c   : > { %292 = vst.msk [vmem:[#allocation2 + $0x61] sm:$0xff] %vm197_vm1, %v259_v2  ;;  %v267_v7 = vld [vmem:[%s3561_s8 + $0x70] sm:$0xff]  ;;  %v268_v16 = vld [vmem:[%s3561_s8 + $0x78] sm:$0xff]  ;;  %v269_v19 = vld [vmem:[%s3561_s8 + $0x80] sm:$0xff]  ;;  %s2967_s16 = scalar_lea.hbm %s4769_s4, %s3351_s13  ;;  %s2968_s0 = sshll.u32 %s4562_s12, 4  ;;  %s2969_s0 = int_to_ptr.vmem [resolvable:$true] %s2968_s0 }
  0x1d   : > { %205 = vst.msk [vmem:[#allocation2 + $0x30] sm:$0xff] %vm197_vm1, %v3462_v1  ;;  %v275_v9 = vld [vmem:[%s3561_s8 + $0xb0] sm:$0xff]  ;;  %v276_v17 = vld [vmem:[%s3561_s8 + $0xb8] sm:$0xff]  ;;  %v277_v20 = vld [vmem:[%s3561_s8 + $0xc0] sm:$0xff]  ;;  %s2970_s21 = sshll.u32 %s2967_s16, 4  ;;  %s2956_s23 = scalar_lea.sflag [#allocation5], %s189_s10  ;;  %s2971_s21 = int_to_ptr.hbm [resolvable:$true] %s2970_s21 }
  0x1e   : > { %206 = vst.msk [vmem:[#allocation2 + $0x38] sm:$0xff] %vm197_vm1, %v3462_v1  ;;  %v262_v21 = vld [vmem:[%s3561_s8 + $0x48] sm:$0xff]  ;;  %v253_v23 = vld [vmem:[%s3561_s8] sm:$0xff]  ;;  %v263_v25 = vld [vmem:[%s3561_s8 + $0x50] sm:$0xff]  ;;  %s3412_s24 = sshra.s32 %s2971_s21, 4  ;;  %s3418_s5 = scalar_lea.hbm %s4769_s4, 512  ;;  %s3413_s24 = int_to_ptr.hbm [resolvable:$true] %s3412_s24 }
  0x1f   : > { %208 = vst.msk [vmem:[#allocation2 + $0x48] sm:$0xff] %vm197_vm1, %v3462_v1  ;;  %v322_v8 = vld [vmem:[#allocation2] sm:$0xff]  ;;  %v270_v22 = vld [vmem:[%s3561_s8 + $0x88] sm:$0xff]  ;;  %v271_v27 = vld [vmem:[%s3561_s8 + $0x90] sm:$0xff]  ;;  %s3414_s28 = scalar_lea.hbm %s3413_s24, 256  ;;  %p3419_p0 = scmp.lt.s32.totalorder %s3413_s24, %s4769_s4 }
  0x20   : > { %209 = vst.msk [vmem:[#allocation2 + $0x50] sm:$0xff] %vm197_vm1, %v3462_v1  ;;  %3041 = vmatmul.msk.f32.vlgmr.msra.gmra.mxu0 %vm197_vm1, %v322_v8  ;;  %v323_v12 = vld [vmem:[#allocation2 + $0x8] sm:$0xff]  ;;  %v279_v31 = vld [vmem:[%s3561_s8 + $0xd0] sm:$0xff]  ;;  %v264_v32 = vld [vmem:[%s3561_s8 + $0x58] sm:$0xff]  ;;  %p3415_p11 = scmp.ne.s32.totalorder %s3413_s24, %s3414_s28  ;;  %p3420_p1 = scmp.lt.s32.totalorder %s3418_s5, %s3414_s28 }
  0x21   : > { %214 = vst.msk [vmem:[#allocation2 + $0x78] sm:$0xff] %vm197_vm1, %v3462_v1  ;;  %v278_v24 = vld [vmem:[%s3561_s8 + $0xc8] sm:$0xff]  ;;  %v272_v33 = vld [vmem:[%s3561_s8 + $0x98] sm:$0xff]  ;;  %v255_v34 = vld [vmem:[%s3561_s8 + $0x10] sm:$0xff]  ;;  %3312 = vmatpush.msk.msra.mxu0 %vm451_vm0, %v3311_v0 }
  0x22   : > { %215 = vst.msk [vmem:[#allocation2 + $0x80] sm:$0xff] %vm197_vm1, %v3462_v1  ;;  %v254_v29 = vld [vmem:[%s3561_s8 + $0x8] sm:$0xff]  ;;  %v280_v36 = vld [vmem:[%s3561_s8 + $0xd8] sm:$0xff]  ;;  %v265_v39 = vld [vmem:[%s3561_s8 + $0x60] sm:$0xff]  ;;  %p3416_p12 = pnand %p3415_p11, %p3531_p5  ;;  %p3421_p2 = por %p3420_p1, %p3419_p0 }
  0x23   : > { %v3581_v3 = vld [vmem:[#allocation2 + $0x60] sm:$0xff]  ;;  %217 = vst.msk [vmem:[#allocation2 + $0x90] sm:$0xff] %vm197_vm1, %v3462_v1  ;;  %v256_v42 = vld [vmem:[%s3561_s8 + $0x18] sm:$0xff]  ;;  %v266_v44 = vld [vmem:[%s3561_s8 + $0x68] sm:$0xff] }
  0x24   : > { %3049 = vmatmul.msk.f32.vlgmr.msra.gmra.mxu1 %vm197_vm1, %v3581_v3  ;;  %218 = vst.msk [vmem:[#allocation2 + $0x98] sm:$0xff] %vm197_vm1, %v3462_v1  ;;  %v273_v41 = vld [vmem:[%s3561_s8 + $0xa0] sm:$0xff]  ;;  %v274_v45 = vld [vmem:[%s3561_s8 + $0xa8] sm:$0xff]  ;;  %p3417_p13 = pneg %p3416_p12 }
  0x25   : > { %220 = vst.msk [vmem:[#allocation2 + $0xa8] sm:$0xff] %vm197_vm1, %v3462_v1  ;;  %v281_v43 = vld [vmem:[%s3561_s8 + $0xe0] sm:$0xff]  ;;  %v282_v49 = vld [vmem:[%s3561_s8 + $0xe8] sm:$0xff]  ;;  %3210 = vmatpush.msk.msra.mxu1 %vm451_vm0, %v3209_v59 }
  0x26   : > { %221 = vst.msk [vmem:[#allocation2 + $0xb0] sm:$0xff] %vm197_vm1, %v3462_v1  ;;  %v257_v47 = vld [vmem:[%s3561_s8 + $0x20] sm:$0xff]  ;;  %v258_v52 = vld [vmem:[%s3561_s8 + $0x28] sm:$0xff]  ;;  %p3422_p3 = pnand %p3421_p2, %p3417_p13 }
  0x27   : > { %223 = vst.msk [vmem:[#allocation2 + $0xc0] sm:$0xff] %vm197_vm1, %v3462_v1 }
  0x28   : > { %224 = vst.msk [vmem:[#allocation2 + $0xc8] sm:$0xff] %vm197_vm1, %v3462_v1  ;;  %3042 = vmatmul.msk.f32.gmra.mxu0 %vm197_vm1, %v323_v12 }
  0x29   : > { %226 = vst.msk [vmem:[#allocation2 + $0xd8] sm:$0xff] %vm197_vm1, %v3462_v1 }
  0x2a   : > { %227 = vst.msk [vmem:[#allocation2 + $0xe0] sm:$0xff] %vm197_vm1, %v3462_v1 }
  0x2b   : > { %229 = vst.msk [vmem:[#allocation2 + $0xf0] sm:$0xff] %vm197_vm1, %v3462_v1 }
  0x2c   : > { %230 = vst.msk [vmem:[#allocation2 + $0xf8] sm:$0xff] %vm197_vm1, %v3462_v1 }
  0x2d   : > { %232 = vst.msk [vmem:[#allocation2 + $0x108] sm:$0xff] %vm197_vm1, %v3462_v1 }
  0x2e   : > { %233 = vst.msk [vmem:[#allocation2 + $0x110] sm:$0xff] %vm197_vm1, %v3462_v1 }
  0x2f   : > { %235 = vst.msk [vmem:[#allocation2 + $0x120] sm:$0xff] %vm197_vm1, %v3462_v1 }
  0x30   : > { %236 = vst.msk [vmem:[#allocation2 + $0x128] sm:$0xff] %vm197_vm1, %v3462_v1 }
  0x31   : > { %238 = vst.msk [vmem:[#allocation2 + $0x138] sm:$0xff] %vm197_vm1, %v3462_v1 }
  0x32   : > { %239 = vst.msk [vmem:[#allocation2 + $0x140] sm:$0xff] %vm197_vm1, %v3462_v1 }
  0x33   : > { %241 = vst.msk [vmem:[#allocation2 + $0x150] sm:$0xff] %vm197_vm1, %v3462_v1 }
  0x34   : > { %242 = vst.msk [vmem:[#allocation2 + $0x158] sm:$0xff] %vm197_vm1, %v3462_v1 }
  0x35   : > { %244 = vst.msk [vmem:[#allocation2 + $0x168] sm:$0xff] %vm197_vm1, %v3462_v1 }
  0x36   : > { %245 = vst.msk [vmem:[#allocation2 + $0x170] sm:$0xff] %vm197_vm1, %v3462_v1 }
  0x37   : > { %247 = vst.msk [vmem:[#allocation2 + $0x180] sm:$0xff] %vm197_vm1, %v3462_v1 }
  0x38   : > { %248 = vst.msk [vmem:[#allocation2 + $0x188] sm:$0xff] %vm197_vm1, %v3462_v1 }
  0x39   : > { %250 = vst.msk [vmem:[#allocation2 + $0x198] sm:$0xff] %vm197_vm1, %v3462_v1 }
  0x3a   : > { %251 = vst.msk [vmem:[#allocation2 + $0x1a0] sm:$0xff] %vm197_vm1, %v3462_v1 }
  0x3b   : > { %300 = vst.msk [vmem:[#allocation2 + $0xc1] sm:$0xff] %vm197_vm1, %v267_v7 }
  0x3c   : > { %308 = vst.msk [vmem:[#allocation2 + $0x121] sm:$0xff] %vm197_vm1, %v275_v9  ;;  %v600_v9 = vld [vmem:[#allocation2 + $0x1] sm:$0xff] }
  0x3d   : > { %213 = vst.msk [vmem:[#allocation2 + $0x70] sm:$0x3] %vm200_vm2, %v3462_v1 }
  0x3e   : > { %293 = vst.msk [vmem:[#allocation2 + $0x69] sm:$0xff] %vm197_vm1, %v260_v11  ;;  %v878_v11 = vld [vmem:[#allocation2 + $0x2] sm:$0xff] }
  0x3f   : > { %201 = vst.msk [vmem:[#allocation2 + $0x10] sm:$0x3] %vm200_vm2, %v3462_v1 }
  0x40   : > { %204 = vst.msk [vmem:[#allocation2 + $0x28] sm:$0x3] %vm200_vm2, %v3462_v1 }
  0x41   : > { %207 = vst.msk [vmem:[#allocation2 + $0x40] sm:$0x3] %vm200_vm2, %v3462_v1 }
  0x42   : > { %v3665_v13 = vld [vmem:[#allocation2 + $0xc0] sm:$0xff]  ;;  %210 = vst.msk [vmem:[#allocation2 + $0x58] sm:$0x3] %vm200_vm2, %v3462_v1 }
  0x43   : > { %3057 = vmatmul.msk.f32.vlgmr.msra.gmra.mxu2 %vm197_vm1, %v3665_v13  ;;  %v3671_v14 = vld [vmem:[#allocation2 + $0x120] sm:$0xff]  ;;  %216 = vst.msk [vmem:[#allocation2 + $0x88] sm:$0x3] %vm200_vm2, %v3462_v1 }
  0x44   : > { %3065 = vmatmul.msk.f32.vlgmr.msra.gmra.mxu3 %vm197_vm1, %v3671_v14  ;;  %219 = vst.msk [vmem:[#allocation2 + $0xa0] sm:$0x3] %vm200_vm2, %v3462_v1  ;;  %3244 = vmatpush.msk.msra.mxu2 %vm451_vm0, %v3243_v57 }
  0x45   : > { %v3679_v15 = vld [vmem:[#allocation2 + $0x68] sm:$0xff]  ;;  %222 = vst.msk [vmem:[#allocation2 + $0xb8] sm:$0x3] %vm200_vm2, %v3462_v1  ;;  %3278 = vmatpush.msk.msra.mxu3 %vm451_vm0, %v3277_v58 }
  0x46   : > { %3050 = vmatmul.msk.f32.gmra.mxu1 %vm197_vm1, %v3679_v15  ;;  %225 = vst.msk [vmem:[#allocation2 + $0xd0] sm:$0x3] %vm200_vm2, %v3462_v1  ;;  %v601_v12 = vld [vmem:[#allocation2 + $0x9] sm:$0xff] }
  0x47   : > { %228 = vst.msk [vmem:[#allocation2 + $0xe8] sm:$0x3] %vm200_vm2, %v3462_v1 }
  0x48   : > { %231 = vst.msk [vmem:[#allocation2 + $0x100] sm:$0x3] %vm200_vm2, %v3462_v1 }
  0x49   : > { %234 = vst.msk [vmem:[#allocation2 + $0x118] sm:$0x3] %vm200_vm2, %v3462_v1 }
  0x4a   : > { %237 = vst.msk [vmem:[#allocation2 + $0x130] sm:$0x3] %vm200_vm2, %v3462_v1 }
  0x4b   : > { %240 = vst.msk [vmem:[#allocation2 + $0x148] sm:$0x3] %vm200_vm2, %v3462_v1 }
  0x4c   : > { %243 = vst.msk [vmem:[#allocation2 + $0x160] sm:$0x3] %vm200_vm2, %v3462_v1 }
  0x4d   : > { %246 = vst.msk [vmem:[#allocation2 + $0x178] sm:$0x3] %vm200_vm2, %v3462_v1 }
  0x4e   : > { %249 = vst.msk [vmem:[#allocation2 + $0x190] sm:$0x3] %vm200_vm2, %v3462_v1 }
  0x4f   : > { %252 = vst.msk [vmem:[#allocation2 + $0x1a8] sm:$0x3] %vm200_vm2, %v3462_v1 }
  0x50   : > { %301 = vst.msk [vmem:[#allocation2 + $0xc9] sm:$0xff] %vm197_vm1, %v268_v16 }
  0x51   : > { %309 = vst.msk [vmem:[#allocation2 + $0x129] sm:$0xff] %vm197_vm1, %v276_v17  ;;  %v879_v17 = vld [vmem:[#allocation2 + $0xa] sm:$0xff] }
  0x52   : > { %294 = vst.msk [vmem:[#allocation2 + $0x79] sm:$0xff] %vm197_vm1, %v261_v18 }
  0x53   : > { %302 = vst.msk [vmem:[#allocation2 + $0xd9] sm:$0xff] %vm197_vm1, %v269_v19 }
  0x54   : > { %310 = vst.msk [vmem:[#allocation2 + $0x139] sm:$0xff] %vm197_vm1, %v277_v20 }
  0x55   : > { %295 = vst.msk [vmem:[#allocation2 + $0x81] sm:$0xff] %vm197_vm1, %v262_v21 }
  0x56   : > { %303 = vst.msk [vmem:[#allocation2 + $0xe1] sm:$0xff] %vm197_vm1, %v270_v22 }
  0x57   : > { %v3722_v26 = vld [vmem:[#allocation2 + $0xc8] sm:$0xff]  ;;  %286 = vst.msk [vmem:[#allocation2 + $0x19] sm:$0xff] %vm197_vm1, %v253_v23 }
  0x58   : > { %3058 = vmatmul.msk.f32.gmra.mxu2 %vm197_vm1, %v3722_v26  ;;  %v3728_v28 = vld [vmem:[#allocation2 + $0x128] sm:$0xff]  ;;  %311 = vst.msk [vmem:[#allocation2 + $0x141] sm:$0xff] %vm197_vm1, %v278_v24 }
  0x59   : > { %3066 = vmatmul.msk.f32.gmra.mxu3 %vm197_vm1, %v3728_v28  ;;  %v3734_v30 = vld [vmem:[#allocation2 + $0x78] sm:$0xff]  ;;  %296 = vst.msk [vmem:[#allocation2 + $0x91] sm:$0xff] %vm197_vm1, %v263_v25 }
  0x5a   : > { %3051 = vmatmul.msk.f32.gmra.mxu1 %vm197_vm1, %v3734_v30  ;;  %304 = vst.msk [vmem:[#allocation2 + $0xf1] sm:$0xff] %vm197_vm1, %v271_v27  ;;  %v3746_v35 = vld [vmem:[#allocation2 + $0xd8] sm:$0xff]  ;;  %v3935_v27 = vld [vmem:[#allocation2 + $0x61] sm:$0xff] }
  0x5b   : > { %287 = vst.msk [vmem:[#allocation2 + $0x21] sm:$0xff] %vm197_vm1, %v254_v29  ;;  %v3750_v37 = vld [vmem:[#allocation2 + $0x138] sm:$0xff] }
  0x5c   : > { %312 = vst.msk [vmem:[#allocation2 + $0x151] sm:$0xff] %vm197_vm1, %v279_v31  ;;  %v3756_v40 = vld [vmem:[#allocation2 + $0x80] sm:$0xff] }
  0x5d   : > { %297 = vst.msk [vmem:[#allocation2 + $0x99] sm:$0xff] %vm197_vm1, %v264_v32  ;;  %v3780_v48 = vld [vmem:[#allocation2 + $0xe0] sm:$0xff]  ;;  %v3949_v32 = vld [vmem:[#allocation2 + $0x69] sm:$0xff] }
  0x5e   : > { %v3752_v38 = vld [vmem:[#allocation2 + $0x18] sm:$0xff]  ;;  %305 = vst.msk [vmem:[#allocation2 + $0xf9] sm:$0xff] %vm197_vm1, %v272_v33  ;;  %v4025_v0 = vld [vmem:[#allocation2 + $0x82] sm:$0xff] }
  0x5f   : > { %3043 = vmatmul.msk.f32.gmra.mxu0 %vm197_vm1, %v3752_v38  ;;  %288 = vst.msk [vmem:[#allocation2 + $0x31] sm:$0xff] %vm197_vm1, %v255_v34  ;;  %v3784_v50 = vld [vmem:[#allocation2 + $0x140] sm:$0xff] }
  0x60   : > { %3059 = vmatmul.msk.f32.gmra.mxu2 %vm197_vm1, %v3746_v35  ;;  %313 = vst.msk [vmem:[#allocation2 + $0x159] sm:$0xff] %vm197_vm1, %v280_v36  ;;  %v3787_v51 = vld [vmem:[#allocation2 + $0x90] sm:$0xff]  ;;  %v1434_v10 = vld [vmem:[#allocation2 + $0x19] sm:$0xff]  ;;  %v3965_v36 = vld [vmem:[#allocation2 + $0x62] sm:$0xff] }
  0x61   : > { %3067 = vmatmul.msk.f32.gmra.mxu3 %vm197_vm1, %v3750_v37  ;;  %298 = vst.msk [vmem:[#allocation2 + $0xa9] sm:$0xff] %vm197_vm1, %v265_v39  ;;  %v3803_v54 = vld [vmem:[#allocation2 + $0xf0] sm:$0xff] }
  0x62   : > { %3052 = vmatmul.msk.f32.gmra.mxu1 %vm197_vm1, %v3756_v40  ;;  %306 = vst.msk [vmem:[#allocation2 + $0x109] sm:$0xff] %vm197_vm1, %v273_v41  ;;  %v3776_v46 = vld [vmem:[#allocation2 + $0x20] sm:$0xff] }
  0x63   : > { %289 = vst.msk [vmem:[#allocation2 + $0x39] sm:$0xff] %vm197_vm1, %v256_v42  ;;  %v3805_v55 = vld [vmem:[#allocation2 + $0x150] sm:$0xff]  ;;  %v1435_v16 = vld [vmem:[#allocation2 + $0x21] sm:$0xff] }
  0x64   : > { %314 = vst.msk [vmem:[#allocation2 + $0x169] sm:$0xff] %vm197_vm1, %v281_v43  ;;  %v3807_v56 = vld [vmem:[#allocation2 + $0x98] sm:$0xff]  ;;  %v3901_v21 = vld [vmem:[#allocation2 + $0x22] sm:$0xff]  ;;  %v3985_v43 = vld [vmem:[#allocation2 + $0x6a] sm:$0xff] }
  0x65   : > { %299 = vst.msk [vmem:[#allocation2 + $0xb1] sm:$0xff] %vm197_vm1, %v266_v44  ;;  %v3831_v61 = vld [vmem:[#allocation2 + $0xf8] sm:$0xff]  ;;  %v3983_v42 = vld [vmem:[#allocation2 + $0x81] sm:$0xff] }
  0x66   : > { %307 = vst.msk [vmem:[#allocation2 + $0x111] sm:$0xff] %vm197_vm1, %v274_v45  ;;  %v3801_v53 = vld [vmem:[#allocation2 + $0x30] sm:$0xff]  ;;  %v3890_v19 = vld [vmem:[#allocation2 + $0x1a] sm:$0xff] }
  0x67   : > { %3044 = vmatmul.msk.f32.gmra.mxu0 %vm197_vm1, %v3776_v46  ;;  %290 = vst.msk [vmem:[#allocation2 + $0x49] sm:$0xff] %vm197_vm1, %v257_v47  ;;  %v3833_v62 = vld [vmem:[#allocation2 + $0x158] sm:$0xff] }
  0x68   : > { %3060 = vmatmul.msk.f32.gmra.mxu2 %vm197_vm1, %v3780_v48  ;;  %315 = vst.msk [vmem:[#allocation2 + $0x171] sm:$0xff] %vm197_vm1, %v282_v49  ;;  %v3835_v63 = vld [vmem:[#allocation2 + $0xa8] sm:$0xff]  ;;  %v3888_v18 = vld [vmem:[#allocation2 + $0x31] sm:$0xff]  ;;  %v4005_v49 = vld [vmem:[#allocation2 + $0x7a] sm:$0xff] }
  0x69   : > { %3068 = vmatmul.msk.f32.gmra.mxu3 %vm197_vm1, %v3784_v50  ;;  %291 = vst.msk [vmem:[#allocation2 + $0x51] sm:$0xff] %vm197_vm1, %v258_v52  ;;  %v3851_v2 = vld [vmem:[#allocation2 + $0x108] sm:$0xff]  ;;  %v4003_v47 = vld [vmem:[#allocation2 + $0x91] sm:$0xff]  ;;  %v4023_v59 = vld [vmem:[#allocation2 + $0x99] sm:$0xff] }
  0x6a   : > { %3053 = vmatmul.msk.f32.gmra.mxu1 %vm197_vm1, %v3787_v51  ;;  %v3829_v60 = vld [vmem:[#allocation2 + $0x38] sm:$0xff]  ;;  %4803 = vst [vmem:[#allocation7_spill] sm:$0xff] %v3935_v27 }
  0x6b   : > { %v3853_v4 = vld [vmem:[#allocation2 + $0x168] sm:$0xff]  ;;  %v3899_v20 = vld [vmem:[#allocation2 + $0x39] sm:$0xff]  ;;  %4804 = vst [vmem:[#allocation8_spill] sm:$0xff] %v3949_v32 }
  0x6c   : > { %v3855_v5 = vld [vmem:[#allocation2 + $0xb0] sm:$0xff]  ;;  %v3925_v25 = vld [vmem:[#allocation2 + $0x3a] sm:$0xff]  ;;  %4806 = vst [vmem:[#allocation10_spill] sm:$0xff] %v3965_v36 }
  0x6d   : > { %v3867_v7 = vld [vmem:[#allocation2 + $0x110] sm:$0xff]  ;;  %4808 = vst [vmem:[#allocation12_spill] sm:$0xff] %v3983_v42 }
  0x6e   : > { %v3849_v1 = vld [vmem:[#allocation2 + $0x48] sm:$0xff]  ;;  %v3913_v23 = vld [vmem:[#allocation2 + $0x32] sm:$0xff]  ;;  %4809 = vst [vmem:[#allocation13_spill] sm:$0xff] %v3985_v43 }
  0x6f   : > { %3045 = vmatmul.msk.f32.gmra.mxu0 %vm197_vm1, %v3801_v53  ;;  %v3869_v8 = vld [vmem:[#allocation2 + $0x170] sm:$0xff]  ;;  %4811 = vst [vmem:[#allocation15_spill] sm:$0xff] %v4003_v47 }
  0x70   : > { %3061 = vmatmul.msk.f32.gmra.mxu2 %vm197_vm1, %v3803_v54  ;;  %v3865_v6 = vld [vmem:[#allocation2 + $0x50] sm:$0xff]  ;;  %4812 = vst [vmem:[#allocation16_spill] sm:$0xff] %v4005_v49 }
  0x71   : > { %3069 = vmatmul.msk.f32.gmra.mxu3 %vm197_vm1, %v3805_v55  ;;  %v3911_v22 = vld [vmem:[#allocation2 + $0x49] sm:$0xff]  ;;  %v3923_v24 = vld [vmem:[#allocation2 + $0x51] sm:$0xff]  ;;  %4814 = vst [vmem:[#allocation18_spill] sm:$0xff] %v4023_v59 }
  0x72   : > { %3054 = vmatmul.msk.f32.gmra.mxu1 %vm197_vm1, %v3807_v56  ;;  %v3937_v29 = vld [vmem:[#allocation2 + $0x4a] sm:$0xff]  ;;  %v3951_v33 = vld [vmem:[#allocation2 + $0x52] sm:$0xff]  ;;  %4815 = vst [vmem:[#allocation19_spill] sm:$0xff] %v4025_v0 }
  0x77   : > { %3046 = vmatmul.msk.f32.gmra.mxu0 %vm197_vm1, %v3829_v60 }
  0x78   : > { %3062 = vmatmul.msk.f32.gmra.mxu2 %vm197_vm1, %v3831_v61 }
  0x79   : > { %3070 = vmatmul.msk.f32.gmra.mxu3 %vm197_vm1, %v3833_v62 }
  0x7a   : > { %3055 = vmatmul.msk.f32.gmra.mxu1 %vm197_vm1, %v3835_v63 }
  0x7f   : > { %3047 = vmatmul.msk.f32.gmra.mxu0 %vm197_vm1, %v3849_v1 }
  0x80   : > { %3063 = vmatmul.msk.f32.gmra.mxu2 %vm197_vm1, %v3851_v2 }
  0x81   : > { %3071 = vmatmul.msk.f32.gmra.mxu3 %vm197_vm1, %v3853_v4 }
  0x82   : > { %3056 = vmatmul.msk.f32.gmra.mxu1 %vm197_vm1, %v3855_v5 }
  0x87   : > { %3048 = vmatmul.msk.f32.gmra.mxu0 %vm197_vm1, %v3865_v6 }
  0x88   : > { %3064 = vmatmul.msk.f32.gmra.mxu2 %vm197_vm1, %v3867_v7 }
  0x89   : > { %3072 = vmatmul.msk.f32.gmra.mxu3 %vm197_vm1, %v3869_v8 }
  0x8a   : > { %3075 = vmatmul.msk.f32.vlgmr.msrb.gmra.mxu1 %vm197_vm1, %v600_v9 }
  0x8f   : > { %3177 = vmatmul.msk.f32.vlgmr.msrb.gmra.mxu0 %vm197_vm1, %v1434_v10 }
  0x90   : > { %3109 = vmatmul.msk.f32.vlgmr.msrb.gmra.mxu2 %vm197_vm1, %v878_v11 }
  0x91   : > { %3143 = vmatmul.msk.f32.vlgmr.msrb.gmra.mxu3 %vm197_vm1, %v3752_v38 }
  0x92   : > { %3076 = vmatmul.msk.f32.gmra.mxu1 %vm197_vm1, %v601_v12  ;;  %v4043_v12 = vld [vmem:[#allocation2 + $0xa9] sm:$0xff] }
  0x93   : > { %4817 = vst [vmem:[#allocation21_spill] sm:$0xff] %v4043_v12 }
  0x97   : > { %3178 = vmatmul.msk.f32.gmra.mxu0 %vm197_vm1, %v1435_v16 }
  0x98   : > { %3110 = vmatmul.msk.f32.gmra.mxu2 %vm197_vm1, %v879_v17 }
  0x99   : > { %3144 = vmatmul.msk.f32.gmra.mxu3 %vm197_vm1, %v3776_v46 }
  0x9a   : > { %3077 = vmatmul.msk.f32.gmra.mxu1 %vm197_vm1, %v1434_v10 }
  0x9d   : > { %v3957_v34 = vpop.f32.mrf.mxu0 }
  0x9f   : > { %3179 = vmatmul.msk.f32.gmra.mxu0 %vm197_vm1, %v3888_v18 }
  0xa0   : > { %3111 = vmatmul.msk.f32.gmra.mxu2 %vm197_vm1, %v3890_v19 }
  0xa1   : > { %3145 = vmatmul.msk.f32.gmra.mxu3 %vm197_vm1, %v3801_v53  ;;  %v3947_v31 = vpop.f32.mrf.mxu1 }
  0xa2   : > { %3078 = vmatmul.msk.f32.gmra.mxu1 %vm197_vm1, %v1435_v16  ;;  %v4045_v16 = vld [vmem:[#allocation2 + $0x92] sm:$0xff] }
  0xa3   : > { %4818 = vst [vmem:[#allocation22_spill] sm:$0xff] %v4045_v16 }
  0xa5   : > { %v3981_v41 = vpop.f32.mrf.mxu0 }
  0xa7   : > { %3180 = vmatmul.msk.f32.gmra.mxu0 %vm197_vm1, %v3899_v20 }
  0xa8   : > { %3112 = vmatmul.msk.f32.gmra.mxu2 %vm197_vm1, %v3901_v21 }
  0xa9   : > { %3146 = vmatmul.msk.f32.gmra.mxu3 %vm197_vm1, %v3829_v60 }
  0xaa   : > { %3079 = vmatmul.msk.f32.gmra.mxu1 %vm197_vm1, %v3888_v18 }
  0xaf   : > { %3181 = vmatmul.msk.f32.gmra.mxu0 %vm197_vm1, %v3911_v22 }
  0xb0   : > { %3113 = vmatmul.msk.f32.gmra.mxu2 %vm197_vm1, %v3913_v23 }
  0xb1   : > { %3147 = vmatmul.msk.f32.gmra.mxu3 %vm197_vm1, %v3849_v1 }
  0xb2   : > { %3080 = vmatmul.msk.f32.gmra.mxu1 %vm197_vm1, %v3899_v20 }
  0xb7   : > { %3182 = vmatmul.msk.f32.gmra.mxu0 %vm197_vm1, %v3923_v24 }
  0xb8   : > { %3114 = vmatmul.msk.f32.gmra.mxu2 %vm197_vm1, %v3925_v25 }
  0xb9   : > { %3148 = vmatmul.msk.f32.gmra.mxu3 %vm197_vm1, %v3865_v6 }
  0xba   : > { %3081 = vmatmul.msk.f32.gmra.mxu1 %vm197_vm1, %v3911_v22 }
  0xbf   : > { %3183 = vmatmul.msk.f32.gmra.mxu0 %vm197_vm1, %v3935_v27 }
  0xc0   : > { %3115 = vmatmul.msk.f32.gmra.mxu2 %vm197_vm1, %v3937_v29 }
  0xc1   : > { %3149 = vmatmul.msk.f32.gmra.mxu3 %vm197_vm1, %v3581_v3  ;;  %v3963_v3 = vld [vmem:[#allocation2 + $0x79] sm:$0xff] }
  0xc2   : > { %3082 = vmatmul.msk.f32.gmra.mxu1 %vm197_vm1, %v3923_v24  ;;  %4805 = vst [vmem:[#allocation9_spill] sm:$0xff] %v3963_v3 }
  0xc3   : > { %v3967_v38 = vpop.f32.mrf.mxu1 }
  0xc6   : > { %v3975_v39 = vpop.f32.mrf.mxu2 }
  0xc7   : > { %3184 = vmatmul.msk.f32.gmra.mxu0 %vm197_vm1, %v3949_v32 }
  0xc8   : > { %3116 = vmatmul.msk.f32.gmra.mxu2 %vm197_vm1, %v3951_v33 }
  0xc9   : > { %3150 = vmatmul.msk.f32.gmra.mxu3 %vm197_vm1, %v3679_v15  ;;  %v3977_v15 = vpop.f32.mrf.mxu3 }
  0xca   : > { %3083 = vmatmul.msk.f32.gmra.mxu1 %vm197_vm1, %v3935_v27  ;;  %4807 = vst [vmem:[#allocation11_spill] sm:$0xff] %v3977_v15  ;;  %v4138_v27 = vld [vmem:[#allocation2 + $0xe1] sm:$0xff] }
  0xcf   : > { %3185 = vmatmul.msk.f32.gmra.mxu0 %vm197_vm1, %v3963_v3 }
  0xd0   : > { %3117 = vmatmul.msk.f32.gmra.mxu2 %vm197_vm1, %v3965_v36 }
  0xd1   : > { %3151 = vmatmul.msk.f32.gmra.mxu3 %vm197_vm1, %v3734_v30 }
  0xd2   : > { %3084 = vmatmul.msk.f32.gmra.mxu1 %vm197_vm1, %v3949_v32  ;;  %v4126_v32 = vld [vmem:[%s4768_s3] ss:$0 sm:$0xff] }
  0xd7   : > { %v3987_v44 = vpop.f32.mrf.mxu1  ;;  %3186 = vmatmul.msk.f32.gmra.mxu0 %vm197_vm1, %v3983_v42 }
  0xd8   : > { %3118 = vmatmul.msk.f32.gmra.mxu2 %vm197_vm1, %v3985_v43 }
  0xd9   : > { %3152 = vmatmul.msk.f32.gmra.mxu3 %vm197_vm1, %v3756_v40 }
  0xda   : > { %3085 = vmatmul.msk.f32.gmra.mxu1 %vm197_vm1, %v3963_v3  ;;  %v4105_v3 = vld [vmem:[#allocation2 + $0xb2] sm:$0xff] }
  0xdb   : > { %v3997_v30 = vpop.f32.mrf.mxu2  ;;  %4830 = vst [vmem:[#allocation34_spill] sm:$0xff] %v4105_v3 }
  0xdc   : > { %v3999_v45 = vpop.f32.mrf.mxu3  ;;  %v4001_v46 = vpop.f32.mrf.mxu0 }
  0xdd   : > { %4810 = vst [vmem:[#allocation14_spill] sm:$0xff] %v3999_v45  ;;  %v4063_v45 = vld [vmem:[#allocation2 + $0xb1] sm:$0xff] }
  0xde   : > { %4821 = vst [vmem:[#allocation25_spill] sm:$0xff] %v4063_v45 }
  0xdf   : > { %v4007_v52 = vpop.f32.mrf.mxu1  ;;  %3187 = vmatmul.msk.f32.gmra.mxu0 %vm197_vm1, %v4003_v47 }
  0xe0   : > { %3119 = vmatmul.msk.f32.gmra.mxu2 %vm197_vm1, %v4005_v49 }
  0xe1   : > { %3153 = vmatmul.msk.f32.gmra.mxu3 %vm197_vm1, %v3787_v51 }
  0xe2   : > { %3086 = vmatmul.msk.f32.gmra.mxu1 %vm197_vm1, %v3983_v42  ;;  %v4085_v42 = vld [vmem:[#allocation2 + $0xaa] sm:$0xff] }
  0xe3   : > { %v4017_v40 = vpop.f32.mrf.mxu2  ;;  %4826 = vst [vmem:[#allocation30_spill] sm:$0xff] %v4085_v42 }
  0xe4   : > { %v4019_v57 = vpop.f32.mrf.mxu3  ;;  %v4021_v58 = vpop.f32.mrf.mxu0 }
  0xe5   : > { %4813 = vst [vmem:[#allocation17_spill] sm:$0xff] %v4019_v57 }
  0xe7   : > { %v4027_v9 = vpop.f32.mrf.mxu1  ;;  %3188 = vmatmul.msk.f32.gmra.mxu0 %vm197_vm1, %v4023_v59 }
  0xe8   : > { %3120 = vmatmul.msk.f32.gmra.mxu2 %vm197_vm1, %v4025_v0 }
  0xe9   : > { %3154 = vmatmul.msk.f32.gmra.mxu3 %vm197_vm1, %v3807_v56 }
  0xea   : > { %3087 = vmatmul.msk.f32.gmra.mxu1 %vm197_vm1, %v4003_v47  ;;  %v4065_v47 = vld [vmem:[#allocation2 + $0x9a] sm:$0xff] }
  0xeb   : > { %v4037_v51 = vpop.f32.mrf.mxu2  ;;  %4822 = vst [vmem:[#allocation26_spill] sm:$0xff] %v4065_v47 }
  0xec   : > { %v4039_v10 = vpop.f32.mrf.mxu3  ;;  %v4041_v11 = vpop.f32.mrf.mxu0 }
  0xed   : > { %4816 = vst [vmem:[#allocation20_spill] sm:$0xff] %v4039_v10 }
  0xef   : > { %v4047_v17 = vpop.f32.mrf.mxu1  ;;  %3189 = vmatmul.msk.f32.gmra.mxu0 %vm197_vm1, %v4043_v12 }
  0xf0   : > { %3121 = vmatmul.msk.f32.gmra.mxu2 %vm197_vm1, %v4045_v16  ;;  %v4083_v16 = vld [vmem:[#allocation2 + $0xc1] sm:$0xff] }
  0xf1   : > { %3155 = vmatmul.msk.f32.gmra.mxu3 %vm197_vm1, %v3835_v63  ;;  %4825 = vst [vmem:[#allocation29_spill] sm:$0xff] %v4083_v16 }
  0xf2   : > { %3088 = vmatmul.msk.f32.gmra.mxu1 %vm197_vm1, %v4023_v59 }
  0xf3   : > { %v4057_v56 = vpop.f32.mrf.mxu2 }
  0xf4   : > { %4819 = vst [vmem:[#allocation23_spill] sm:$0xff] %v4057_v56  ;;  %v4059_v10 = vpop.f32.mrf.mxu3  ;;  %v4061_v57 = vpop.f32.mrf.mxu0  ;;  %v4140_v56 = vld [vmem:[#allocation2 + $0xca] sm:$0xff] }
  0xf5   : > { %4820 = vst [vmem:[#allocation24_spill] sm:$0xff] %v4059_v10 }
  0xf7   : > { %v4067_v15 = vpop.f32.mrf.mxu1  ;;  %3190 = vmatmul.msk.f32.gmra.mxu0 %vm197_vm1, %v4063_v45 }
  0xf8   : > { %3122 = vmatmul.msk.f32.gmra.mxu2 %vm197_vm1, %v4065_v47  ;;  %v4103_v47 = vld [vmem:[#allocation2 + $0xc9] sm:$0xff] }
  0xf9   : > { %3156 = vmatmul.msk.f32.gmra.mxu3 %vm197_vm1, %v3855_v5  ;;  %4829 = vst [vmem:[#allocation33_spill] sm:$0xff] %v4103_v47 }
  0xfa   : > { %3089 = vmatmul.msk.f32.gmra.mxu1 %vm197_vm1, %v4043_v12 }
  0xfb   : > { %v4077_v63 = vpop.f32.mrf.mxu2 }
  0xfc   : > { %4823 = vst [vmem:[#allocation27_spill] sm:$0xff] %v4077_v63  ;;  %v4079_v10 = vpop.f32.mrf.mxu3  ;;  %v4081_v59 = vpop.f32.mrf.mxu0 }
  0xfd   : > { %4824 = vst [vmem:[#allocation28_spill] sm:$0xff] %v4079_v10 }
  0xff   : > { %v4087_v0 = vpop.f32.mrf.mxu1  ;;  %3191 = vmatmul.msk.f32.gmra.mxu0 %vm197_vm1, %v4083_v16 }
 0x100   : > { %3123 = vmatmul.msk.f32.gmra.mxu2 %vm197_vm1, %v4085_v42  ;;  %v4119_v42 = vld [vmem:[#allocation2 + $0xd9] sm:$0xff] }
 0x101   : > { %3157 = vmatmul.msk.f32.gmra.mxu3 %vm197_vm1, %v3665_v13 }
 0x102   : > { %3090 = vmatmul.msk.f32.gmra.mxu1 %vm197_vm1, %v4063_v45 }
 0x103   : > { %v4097_v5 = vpop.f32.mrf.mxu2 }
 0x104   : > { %4827 = vst [vmem:[#allocation31_spill] sm:$0xff] %v4097_v5  ;;  %v4099_v10 = vpop.f32.mrf.mxu3  ;;  %v4101_v12 = vpop.f32.mrf.mxu0  ;;  %v4121_v5 = vld [vmem:[#allocation2 + $0xc2] sm:$0xff] }
 0x105   : > { %4828 = vst [vmem:[#allocation32_spill] sm:$0xff] %v4099_v10 }
 0x106   : > { %4833 = vst [vmem:[#allocation37_spill] sm:$0xff] %v4121_v5 }
 0x107   : > { %v750_v49 = vpop.f32.mrf.mxu1  ;;  %3192 = vmatmul.msk.f32.gmra.mxu0 %vm197_vm1, %v4103_v47 }
 0x108   : > { %3124 = vmatmul.msk.f32.gmra.mxu2 %vm197_vm1, %v4105_v3 }
 0x109   : > { %3158 = vmatmul.msk.f32.gmra.mxu3 %vm197_vm1, %v3722_v26  ;;  %v568_v26 = vadd.f32 %v4126_v32, %v3957_v34 }
 0x10a   : > { %3091 = vmatmul.msk.f32.gmra.mxu1 %vm197_vm1, %v4083_v16 }
 0x10b   : > { %v4115_v13 = vpop.f32.mrf.mxu2 }
 0x10c   : > { %4831 = vst [vmem:[#allocation35_spill] sm:$0xff] %v4115_v13  ;;  %v4117_v10 = vpop.f32.mrf.mxu3  ;;  %v1584_v45 = vpop.f32.mrf.mxu0 }
 0x10d   : > { %4832 = vst [vmem:[#allocation36_spill] sm:$0xff] %v4117_v10  ;;  %v846_v10 = vadd.f32 %v750_v49, %v568_v26 }
 0x10f   : > { %v753_v3 = vpop.f32.mrf.mxu1  ;;  %3193 = vmatmul.msk.f32.gmra.mxu0 %vm197_vm1, %v4119_v42 }
 0x110   : > { %3125 = vmatmul.msk.f32.gmra.mxu2 %vm197_vm1, %v4121_v5  ;;  %v4156_v5 = vld [vmem:[#allocation2 + $0xda] sm:$0xff] }
 0x111   : > { %3159 = vmatmul.msk.f32.gmra.mxu3 %vm197_vm1, %v3746_v35  ;;  %v569_v35 = vadd.f32 %v4126_v32, %v3981_v41 }
 0x112   : > { %3092 = vmatmul.msk.f32.gmra.mxu1 %vm197_vm1, %v4103_v47  ;;  %v4154_v47 = vld [vmem:[#allocation2 + $0xf1] sm:$0xff] }
 0x113   : > { %v1028_v16 = vpop.f32.mrf.mxu2 }
 0x114   : > { %v1124_v13 = vadd.f32 %v1028_v16, %v846_v10  ;;  %v1306_v63 = vpop.f32.mrf.mxu3  ;;  %v1587_v43 = vpop.f32.mrf.mxu0  ;;  %v847_v10 = vadd.f32 %v753_v3, %v569_v35 }
 0x116   : > { %v1402_v36 = vadd.f32 %v1306_v63, %v1124_v13 }
 0x117   : > { %v756_v34 = vpop.f32.mrf.mxu1  ;;  %3194 = vmatmul.msk.f32.gmra.mxu0 %vm197_vm1, %v4138_v27 }
 0x118   : > { %v4146_v49 = vadd.f32 %v1584_v45, %v1402_v36  ;;  %3126 = vmatmul.msk.f32.gmra.mxu2 %vm197_vm1, %v4140_v56 }
 0x119   : > { %3160 = vmatmul.msk.f32.gmra.mxu3 %vm197_vm1, %v3780_v48  ;;  %v570_v48 = vadd.f32 %v4126_v32, %v4001_v46 }
 0x11a   : > { %4834 = vst [vmem:[#allocation38_spill] sm:$0xff] %v4146_v49  ;;  %3093 = vmatmul.msk.f32.gmra.mxu1 %vm197_vm1, %v4119_v42  ;;  %v4172_v49 = vld [vmem:[#allocation2 + $0xe2] sm:$0xff] }
 0x11b   : > { %v1031_v16 = vpop.f32.mrf.mxu2  ;;  %v848_v45 = vadd.f32 %v756_v34, %v570_v48 }
 0x11c   : > { %v1125_v63 = vadd.f32 %v1031_v16, %v847_v10  ;;  %v1309_v13 = vpop.f32.mrf.mxu3  ;;  %v1590_v26 = vpop.f32.mrf.mxu0 }
 0x11e   : > { %v1403_v36 = vadd.f32 %v1309_v13, %v1125_v63  ;;  %v4170_v13 = vld [vmem:[#allocation2 + $0xf9] sm:$0xff] }
 0x11f   : > { %v759_v41 = vpop.f32.mrf.mxu1  ;;  %3195 = vmatmul.msk.f32.gmra.mxu0 %vm197_vm1, %v4154_v47 }
 0x120   : > { %v4162_v3 = vadd.f32 %v1587_v43, %v1403_v36  ;;  %3127 = vmatmul.msk.f32.gmra.mxu2 %vm197_vm1, %v4156_v5 }
 0x121   : > { %3161 = vmatmul.msk.f32.gmra.mxu3 %vm197_vm1, %v3803_v54  ;;  %v571_v54 = vadd.f32 %v4126_v32, %v4021_v58 }
 0x122   : > { %4835 = vst [vmem:[#allocation39_spill] sm:$0xff] %v4162_v3  ;;  %3094 = vmatmul.msk.f32.gmra.mxu1 %vm197_vm1, %v4138_v27  ;;  %v4188_v3 = vld [vmem:[#allocation2 + $0xf2] sm:$0xff] }
 0x123   : > { %v1034_v35 = vpop.f32.mrf.mxu2  ;;  %v849_v36 = vadd.f32 %v759_v41, %v571_v54 }
 0x124   : > { %v1126_v10 = vadd.f32 %v1034_v35, %v848_v45  ;;  %v1312_v16 = vpop.f32.mrf.mxu3  ;;  %v1593_v63 = vpop.f32.mrf.mxu0 }
 0x126   : > { %v1404_v43 = vadd.f32 %v1312_v16, %v1126_v10  ;;  %v4186_v16 = vld [vmem:[#allocation2 + $0x109] sm:$0xff] }
 0x127   : > { %v762_v46 = vpop.f32.mrf.mxu1  ;;  %3196 = vmatmul.msk.f32.gmra.mxu0 %vm197_vm1, %v4170_v13 }
 0x128   : > { %v4178_v34 = vadd.f32 %v1590_v26, %v1404_v43  ;;  %3128 = vmatmul.msk.f32.gmra.mxu2 %vm197_vm1, %v4172_v49 }
 0x129   : > { %3162 = vmatmul.msk.f32.gmra.mxu3 %vm197_vm1, %v3831_v61  ;;  %v572_v61 = vadd.f32 %v4126_v32, %v4041_v11 }
 0x12a   : > { %4836 = vst [vmem:[#allocation40_spill] sm:$0xff] %v4178_v34  ;;  %3095 = vmatmul.msk.f32.gmra.mxu1 %vm197_vm1, %v4154_v47  ;;  %v4204_v34 = vld [vmem:[#allocation2 + $0xfa] sm:$0xff] }
 0x12b   : > { %v1037_v48 = vpop.f32.mrf.mxu2  ;;  %v850_v43 = vadd.f32 %v762_v46, %v572_v61 }
 0x12c   : > { %v1127_v45 = vadd.f32 %v1037_v48, %v849_v36  ;;  %v1315_v35 = vpop.f32.mrf.mxu3  ;;  %v1596_v10 = vpop.f32.mrf.mxu0 }
 0x12e   : > { %v1405_v58 = vadd.f32 %v1315_v35, %v1127_v45  ;;  %v4202_v35 = vld [vmem:[#allocation2 + $0x111] sm:$0xff] }
 0x12f   : > { %v765_v26 = vpop.f32.mrf.mxu1  ;;  %3197 = vmatmul.msk.f32.gmra.mxu0 %vm197_vm1, %v4186_v16 }
 0x130   : > { %v4194_v41 = vadd.f32 %v1593_v63, %v1405_v58  ;;  %3129 = vmatmul.msk.f32.gmra.mxu2 %vm197_vm1, %v4188_v3 }
 0x131   : > { %3163 = vmatmul.msk.f32.gmra.mxu3 %vm197_vm1, %v3851_v2  ;;  %v573_v2 = vadd.f32 %v4126_v32, %v4061_v57 }
 0x132   : > { %4837 = vst [vmem:[#allocation41_spill] sm:$0xff] %v4194_v41  ;;  %3096 = vmatmul.msk.f32.gmra.mxu1 %vm197_vm1, %v4170_v13  ;;  %v4220_v41 = vld [vmem:[#allocation2 + $0x10a] sm:$0xff] }
 0x133   : > { %v1040_v54 = vpop.f32.mrf.mxu2  ;;  %v851_v58 = vadd.f32 %v765_v26, %v573_v2 }
 0x134   : > { %v1128_v36 = vadd.f32 %v1040_v54, %v850_v43  ;;  %v1318_v48 = vpop.f32.mrf.mxu3  ;;  %v1599_v45 = vpop.f32.mrf.mxu0 }
 0x136   : > { %v1406_v11 = vadd.f32 %v1318_v48, %v1128_v36  ;;  %v4218_v48 = vld [vmem:[#allocation2 + $0x121] sm:$0xff] }
 0x137   : > { %v768_v63 = vpop.f32.mrf.mxu1  ;;  %3198 = vmatmul.msk.f32.gmra.mxu0 %vm197_vm1, %v4202_v35 }
 0x138   : > { %v4210_v46 = vadd.f32 %v1596_v10, %v1406_v11  ;;  %3130 = vmatmul.msk.f32.gmra.mxu2 %vm197_vm1, %v4204_v34 }
 0x139   : > { %3164 = vmatmul.msk.f32.gmra.mxu3 %vm197_vm1, %v3867_v7  ;;  %v574_v7 = vadd.f32 %v4126_v32, %v4081_v59 }
 0x13a   : > { %4838 = vst [vmem:[#allocation42_spill] sm:$0xff] %v4210_v46  ;;  %3097 = vmatmul.msk.f32.gmra.mxu1 %vm197_vm1, %v4186_v16  ;;  %v4236_v46 = vld [vmem:[#allocation2 + $0x112] sm:$0xff] }
 0x13b   : > { %v1043_v61 = vpop.f32.mrf.mxu2  ;;  %v852_v11 = vadd.f32 %v768_v63, %v574_v7 }
 0x13c   : > { %v1129_v43 = vadd.f32 %v1043_v61, %v851_v58  ;;  %v1321_v54 = vpop.f32.mrf.mxu3  ;;  %v1602_v36 = vpop.f32.mrf.mxu0 }
 0x13e   : > { %v1407_v57 = vadd.f32 %v1321_v54, %v1129_v43  ;;  %v4234_v54 = vld [vmem:[#allocation2 + $0x129] sm:$0xff] }
 0x13f   : > { %v771_v10 = vpop.f32.mrf.mxu1  ;;  %3199 = vmatmul.msk.f32.gmra.mxu0 %vm197_vm1, %v4218_v48 }
 0x140   : > { %v4226_v26 = vadd.f32 %v1599_v45, %v1407_v57  ;;  %3131 = vmatmul.msk.f32.gmra.mxu2 %vm197_vm1, %v4220_v41 }
 0x141   : > { %3165 = vmatmul.msk.f32.gmra.mxu3 %vm197_vm1, %v3671_v14  ;;  %v575_v14 = vadd.f32 %v4126_v32, %v4101_v12 }
 0x142   : > { %4839 = vst [vmem:[#allocation43_spill] sm:$0xff] %v4226_v26  ;;  %3098 = vmatmul.msk.f32.gmra.mxu1 %vm197_vm1, %v4202_v35  ;;  %v4252_v26 = vld [vmem:[#allocation2 + $0x122] sm:$0xff] }
 0x143   : > { %v1046_v2 = vpop.f32.mrf.mxu2  ;;  %v853_v57 = vadd.f32 %v771_v10, %v575_v14 }
 0x144   : > { %v1130_v58 = vadd.f32 %v1046_v2, %v852_v11  ;;  %v1324_v61 = vpop.f32.mrf.mxu3  ;;  %v1605_v43 = vpop.f32.mrf.mxu0 }
 0x146   : > { %v1408_v59 = vadd.f32 %v1324_v61, %v1130_v58  ;;  %v4250_v61 = vld [vmem:[#allocation2 + $0x139] sm:$0xff] }
 0x147   : > { %v774_v45 = vpop.f32.mrf.mxu1  ;;  %3200 = vmatmul.msk.f32.gmra.mxu0 %vm197_vm1, %v4234_v54 }
 0x148   : > { %v4242_v63 = vadd.f32 %v1602_v36, %v1408_v59  ;;  %3132 = vmatmul.msk.f32.gmra.mxu2 %vm197_vm1, %v4236_v46 }
 0x149   : > { %3166 = vmatmul.msk.f32.gmra.mxu3 %vm197_vm1, %v3728_v28  ;;  %v576_v28 = vadd.f32 %v4126_v32, %v3947_v31  ;;  %v4268_v31 = vld [vmem:[#allocation2 + $0x12a] sm:$0xff] }
 0x14a   : > { %3099 = vmatmul.msk.f32.gmra.mxu1 %vm197_vm1, %v4218_v48 }
 0x14b   : > { %v1049_v7 = vpop.f32.mrf.mxu2  ;;  %v854_v59 = vadd.f32 %v774_v45, %v576_v28  ;;  %v283_v28 = vld [vmem:[%s3561_s8 + $0xf0] sm:$0xff] }
 0x14c   : > { %v1131_v11 = vadd.f32 %v1049_v7, %v853_v57  ;;  %v1327_v2 = vpop.f32.mrf.mxu3  ;;  %v1608_v58 = vpop.f32.mrf.mxu0  ;;  %316 = vst.msk [vmem:[#allocation2 + $0x181] sm:$0xff] %vm197_vm1, %v283_v28 }
 0x14e   : > { %v1409_v12 = vadd.f32 %v1327_v2, %v1131_v11  ;;  %v4266_v2 = vld [vmem:[#allocation2 + $0x141] sm:$0xff] }
 0x14f   : > { %v777_v36 = vpop.f32.mrf.mxu1  ;;  %3201 = vmatmul.msk.f32.gmra.mxu0 %vm197_vm1, %v4250_v61  ;;  %4841 = vst [vmem:[#allocation45_spill] sm:$0xff] %v4266_v2 }
 0x150   : > { %v4258_v10 = vadd.f32 %v1605_v43, %v1409_v12  ;;  %3133 = vmatmul.msk.f32.gmra.mxu2 %vm197_vm1, %v4252_v26 }
 0x151   : > { %3167 = vmatmul.msk.f32.gmra.mxu3 %vm197_vm1, %v3750_v37  ;;  %v577_v37 = vadd.f32 %v4126_v32, %v3967_v38 }
 0x152   : > { %4840 = vst [vmem:[#allocation44_spill] sm:$0xff] %v4258_v10  ;;  %3100 = vmatmul.msk.f32.gmra.mxu1 %vm197_vm1, %v4234_v54 }
 0x153   : > { %v1052_v14 = vpop.f32.mrf.mxu2 }
 0x154   : > { %v1132_v57 = vadd.f32 %v1052_v14, %v854_v59  ;;  %v1330_v7 = vpop.f32.mrf.mxu3  ;;  %v1611_v11 = vpop.f32.mrf.mxu0  ;;  %v855_v59 = vadd.f32 %v777_v36, %v577_v37  ;;  %v284_v37 = vld [vmem:[%s3561_s8 + $0xf8] sm:$0xff]  ;;  %s2825_s8 = sld [smem:[#allocation3]] }
 0x155   : > { %317 = vst.msk [vmem:[#allocation2 + $0x189] sm:$0xff] %vm197_vm1, %v284_v37 }
 0x156   : > { %v1410_v43 = vadd.f32 %v1330_v7, %v1132_v57 }
 0x157   : > { %v780_v12 = vpop.f32.mrf.mxu1  ;;  %3202 = vmatmul.msk.f32.gmra.mxu0 %vm197_vm1, %v4266_v2 }
 0x158   : > { %v4274_v45 = vadd.f32 %v1608_v58, %v1410_v43  ;;  %3134 = vmatmul.msk.f32.gmra.mxu2 %vm197_vm1, %v4268_v31  ;;  %v4284_v58 = vld [vmem:[#allocation2 + $0x151] sm:$0xff]  ;;  %v4286_v43 = vld [vmem:[#allocation2 + $0x13a] sm:$0xff] }
 0x159   : > { %3168 = vmatmul.msk.f32.gmra.mxu3 %vm197_vm1, %v3784_v50  ;;  %4843 = vst [vmem:[#allocation47_spill] sm:$0xff] %v4284_v58  ;;  %v578_v50 = vadd.f32 %v4126_v32, %v3987_v44  ;;  %v4302_v44 = vld [vmem:[#allocation2 + $0x159] sm:$0xff] }
 0x15a   : > { %4842 = vst [vmem:[#allocation46_spill] sm:$0xff] %v4274_v45  ;;  %3101 = vmatmul.msk.f32.gmra.mxu1 %vm197_vm1, %v4250_v61 }
 0x15b   : > { %v1055_v14 = vpop.f32.mrf.mxu2  ;;  %v856_v28 = vadd.f32 %v780_v12, %v578_v50 }
 0x15c   : > { %v1133_v57 = vadd.f32 %v1055_v14, %v855_v59  ;;  %v1333_v7 = vpop.f32.mrf.mxu3  ;;  %v1614_v38 = vpop.f32.mrf.mxu0 }
 0x15e   : > { %v1411_v45 = vadd.f32 %v1333_v7, %v1133_v57 }
 0x15f   : > { %v783_v10 = vpop.f32.mrf.mxu1  ;;  %3203 = vmatmul.msk.f32.gmra.mxu0 %vm197_vm1, %v4284_v58 }
 0x160   : > { %v4292_v36 = vadd.f32 %v1611_v11, %v1411_v45  ;;  %3135 = vmatmul.msk.f32.gmra.mxu2 %vm197_vm1, %v4286_v43  ;;  %v4304_v11 = vld [vmem:[#allocation2 + $0x142] sm:$0xff] }
 0x161   : > { %3169 = vmatmul.msk.f32.gmra.mxu3 %vm197_vm1, %v3805_v55  ;;  %4845 = vst [vmem:[#allocation49_spill] sm:$0xff] %v4304_v11  ;;  %v579_v55 = vadd.f32 %v4126_v32, %v4007_v52 }
 0x162   : > { %4844 = vst [vmem:[#allocation48_spill] sm:$0xff] %v4292_v36  ;;  %3102 = vmatmul.msk.f32.gmra.mxu1 %vm197_vm1, %v4266_v2  ;;  %v906_v2 = vld [vmem:[#allocation2 + $0x152] sm:$0xff] }
 0x163   : > { %v1058_v59 = vpop.f32.mrf.mxu2  ;;  %v857_v50 = vadd.f32 %v783_v10, %v579_v55 }
 0x164   : > { %v1134_v14 = vadd.f32 %v1058_v59, %v856_v28  ;;  %v1336_v57 = vpop.f32.mrf.mxu3  ;;  %v1617_v7 = vpop.f32.mrf.mxu0 }
 0x166   : > { %v1412_v45 = vadd.f32 %v1336_v57, %v1134_v14  ;;  %v4318_v57 = vld [vmem:[#allocation2 + $0x169] sm:$0xff] }
 0x167   : > { %v786_v36 = vpop.f32.mrf.mxu1  ;;  %3204 = vmatmul.msk.f32.gmra.mxu0 %vm197_vm1, %v4302_v44 }
 0x168   : > { %v4310_v12 = vadd.f32 %v1614_v38, %v1412_v45  ;;  %3136 = vmatmul.msk.f32.gmra.mxu2 %vm197_vm1, %v4304_v11  ;;  %v580_v45 = vadd.f32 %v4126_v32, %v4027_v9  ;;  %v581_v9 = vadd.f32 %v4126_v32, %v4047_v17 }
 0x169   : > { %3170 = vmatmul.msk.f32.gmra.mxu3 %vm197_vm1, %v3833_v62 }
 0x16a   : > { %4846 = vst [vmem:[#allocation50_spill] sm:$0xff] %v4310_v12  ;;  %3103 = vmatmul.msk.f32.gmra.mxu1 %vm197_vm1, %v4284_v58  ;;  %v858_v10 = vadd.f32 %v786_v36, %v580_v45  ;;  %v907_v12 = vld [vmem:[#allocation2 + $0x15a] sm:$0xff] }
 0x16b   : > { %v1061_v37 = vpop.f32.mrf.mxu2 }
 0x16c   : > { %v1135_v28 = vadd.f32 %v1061_v37, %v857_v50  ;;  %v1339_v59 = vpop.f32.mrf.mxu3  ;;  %v1620_v14 = vpop.f32.mrf.mxu0 }
 0x16e   : > { %v1413_v52 = vadd.f32 %v1339_v59, %v1135_v28  ;;  %v1463_v59 = vld [vmem:[#allocation2 + $0x171] sm:$0xff] }
 0x16f   : > { %v789_v38 = vpop.f32.mrf.mxu1  ;;  %3205 = vmatmul.msk.f32.gmra.mxu0 %vm197_vm1, %v4318_v57 }
 0x170   : > { %v4324_v62 = vadd.f32 %v1617_v7, %v1413_v52  ;;  %3137 = vmatmul.msk.f32.gmra.mxu2 %vm197_vm1, %v906_v2 }
 0x171   : > { %3171 = vmatmul.msk.f32.gmra.mxu3 %vm197_vm1, %v3853_v4  ;;  %v859_v4 = vadd.f32 %v789_v38, %v581_v9 }
 0x172   : > { %3104 = vmatmul.msk.f32.gmra.mxu1 %vm197_vm1, %v4302_v44 }
 0x173   : > { %v1064_v55 = vpop.f32.mrf.mxu2 }
 0x174   : > { %v1136_v50 = vadd.f32 %v1064_v55, %v858_v10  ;;  %v1342_v37 = vpop.f32.mrf.mxu3  ;;  %v1623_v28 = vpop.f32.mrf.mxu0  ;;  %v1464_v10 = vld [vmem:[#allocation2 + $0x181] sm:$0xff]  ;;  %v908_v55 = vld [vmem:[#allocation2 + $0x16a] sm:$0xff] }
 0x176   : > { %v1414_v58 = vadd.f32 %v1342_v37, %v1136_v50  ;;  %v1186_v37 = vld [vmem:[#allocation2 + $0x180] sm:$0xff] }
 0x177   : > { %v792_v11 = vpop.f32.mrf.mxu1  ;;  %3206 = vmatmul.msk.f32.gmra.mxu0 %vm197_vm1, %v1463_v59 }
 0x178   : > { %v4334_v2 = vadd.f32 %v1620_v14, %v1414_v58  ;;  %3138 = vmatmul.msk.f32.gmra.mxu2 %vm197_vm1, %v907_v12  ;;  %v582_v58 = vadd.f32 %v4126_v32, %v4067_v15  ;;  %v583_v15 = vadd.f32 %v4126_v32, %v4087_v0  ;;  %v584_v0 = vadd.f32 %v4126_v32, %v3975_v39 }
 0x179   : > { %3172 = vmatmul.msk.f32.gmra.mxu3 %vm197_vm1, %v3869_v8  ;;  %v585_v39 = vadd.f32 %v4126_v32, %v3997_v30  ;;  %v586_v30 = vadd.f32 %v4126_v32, %v4017_v40  ;;  %v587_v40 = vadd.f32 %v4126_v32, %v4037_v51  ;;  %v4848_v51 = vld [vmem:[#allocation10_spill] sm:$0xff] }
 0x17a   : > { %4847 = vst [vmem:[#allocation51_spill] sm:$0xff] %v4334_v2  ;;  %3105 = vmatmul.msk.f32.gmra.mxu1 %vm197_vm1, %v4318_v57  ;;  %v860_v8 = vadd.f32 %v792_v11, %v582_v58 }
 0x17b   : > { %v1067_v36 = vpop.f32.mrf.mxu2 }
 0x17c   : > { %v1137_v7 = vadd.f32 %v1067_v36, %v859_v4  ;;  %v1345_v52 = vpop.f32.mrf.mxu3  ;;  %v1626_v45 = vpop.f32.mrf.mxu0  ;;  %v1465_v36 = vld [vmem:[#allocation2 + $0x189] sm:$0xff] }
 0x17e   : > { %v1415_v50 = vadd.f32 %v1345_v52, %v1137_v7  ;;  %v909_v7 = vld [vmem:[#allocation2 + $0x172] sm:$0xff] }
 0x17f   : > { %v795_v17 = vpop.f32.mrf.mxu1  ;;  %3207 = vmatmul.msk.f32.gmra.mxu0 %vm197_vm1, %v1464_v10  ;;  %v1187_v10 = vld [vmem:[#allocation2 + $0x188] sm:$0xff] }
 0x180   : > { %v4344_v12 = vadd.f32 %v1623_v28, %v1415_v50  ;;  %3139 = vmatmul.msk.f32.gmra.mxu2 %vm197_vm1, %v908_v55  ;;  %v861_v11 = vadd.f32 %v795_v17, %v583_v15 }
 0x181   : > { %3173 = vmatmul.msk.f32.gmra.mxu3 %vm197_vm1, %v1186_v37 }
 0x182   : > { %3106 = vmatmul.msk.f32.gmra.mxu1 %vm197_vm1, %v1463_v59 }
 0x183   : > { %v1070_v14 = vpop.f32.mrf.mxu2 }
 0x184   : > { %v1138_v38 = vadd.f32 %v1070_v14, %v860_v8  ;;  %v1348_v9 = vpop.f32.mrf.mxu3  ;;  %v1629_v4 = vpop.f32.mrf.mxu0 }
 0x186   : > { %v1416_v52 = vadd.f32 %v1348_v9, %v1138_v38 }
 0x187   : > { %v798_v2 = vpop.f32.mrf.mxu1  ;;  %3208 = vmatmul.msk.f32.gmra.mxu0 %vm197_vm1, %v1465_v36 }
 0x188   : > { %v4352_v28 = vadd.f32 %v1626_v45, %v1416_v52  ;;  %3140 = vmatmul.msk.f32.gmra.mxu2 %vm197_vm1, %v909_v7 }
 0x189   : > { %3174 = vmatmul.msk.f32.gmra.mxu3 %vm197_vm1, %v1187_v10 }
 0x18a   : > { %3211 = vmatmul.msk.f32.vlgmr.msra.gmra.mxu1 %vm197_vm1, %v3890_v19  ;;  %v862_v19 = vadd.f32 %v798_v2, %v584_v0 }
 0x18b   : > { %v1073_v59 = vpop.f32.mrf.mxu2 }
 0x18c   : > { %v1139_v55 = vadd.f32 %v1073_v59, %v861_v11  ;;  %v1351_v50 = vpop.f32.mrf.mxu3  ;;  %v1632_v37 = vpop.f32.mrf.mxu0 }
 0x18e   : > { %v1417_v58 = vadd.f32 %v1351_v50, %v1139_v55 }
 0x18f   : > { %v801_v8 = vpop.f32.mrf.mxu1  ;;  %3313 = vmatmul.msk.f32.vlgmr.msra.gmra.mxu0 %vm197_vm1, %v3913_v23 }
 0x190   : > { %v4362_v45 = vadd.f32 %v1629_v4, %v1417_v58  ;;  %3245 = vmatmul.msk.f32.vlgmr.msra.gmra.mxu2 %vm197_vm1, %v3801_v53 }
 0x191   : > { %3279 = vmatmul.msk.f32.vlgmr.msra.gmra.mxu3 %vm197_vm1, %v3888_v18  ;;  %v863_v18 = vadd.f32 %v801_v8, %v585_v39 }
 0x192   : > { %3212 = vmatmul.msk.f32.gmra.mxu1 %vm197_vm1, %v3901_v21 }
 0x193   : > { %v1076_v17 = vpop.f32.mrf.mxu2 }
 0x194   : > { %v1140_v14 = vadd.f32 %v1076_v17, %v862_v19  ;;  %v1354_v38 = vpop.f32.mrf.mxu3  ;;  %v1635_v9 = vpop.f32.mrf.mxu0  ;;  %v1995_v19 = vld [vmem:[#allocation2 + $0x60] sm:$0xff] }
 0x196   : > { %v1418_v36 = vadd.f32 %v1354_v38, %v1140_v14  ;;  %v4849_v38 = vld [vmem:[#allocation23_spill] sm:$0xff] }
 0x197   : > { %v804_v7 = vpop.f32.mrf.mxu1  ;;  %3314 = vmatmul.msk.f32.gmra.mxu0 %vm197_vm1, %v3925_v25 }
 0x198   : > { %v4374_v53 = vadd.f32 %v1632_v37, %v1418_v36  ;;  %3246 = vmatmul.msk.f32.gmra.mxu2 %vm197_vm1, %v3829_v60 }
 0x199   : > { %3280 = vmatmul.msk.f32.gmra.mxu3 %vm197_vm1, %v3899_v20  ;;  %v864_v20 = vadd.f32 %v804_v7, %v586_v30 }
 0x19a   : > { %3213 = vmatmul.msk.f32.gmra.mxu1 %vm197_vm1, %v3913_v23 }
 0x19b   : > { %v1079_v21 = vpop.f32.mrf.mxu2 }
 0x19c   : > { %v1141_v2 = vadd.f32 %v1079_v21, %v863_v18  ;;  %v1357_v4 = vpop.f32.mrf.mxu3  ;;  %v1638_v52 = vpop.f32.mrf.mxu0  ;;  %v1996_v21 = vld [vmem:[#allocation2 + $0x68] sm:$0xff] }
 0x19e   : > { %v1419_v10 = vadd.f32 %v1357_v4, %v1141_v2 }
 0x19f   : > { %v807_v15 = vpop.f32.mrf.mxu1  ;;  %3315 = vmatmul.msk.f32.gmra.mxu0 %vm197_vm1, %v3937_v29 }
 0x1a0   : > { %v4386_v60 = vadd.f32 %v1635_v9, %v1419_v10  ;;  %3247 = vmatmul.msk.f32.gmra.mxu2 %vm197_vm1, %v3849_v1  ;;  %v4852_v10 = vld [vmem:[#allocation27_spill] sm:$0xff] }
 0x1a1   : > { %3281 = vmatmul.msk.f32.gmra.mxu3 %vm197_vm1, %v3911_v22  ;;  %v865_v22 = vadd.f32 %v807_v15, %v587_v40  ;;  %v589_v15 = vadd.f32 %v4126_v32, %v4852_v10 }
 0x1a2   : > { %3214 = vmatmul.msk.f32.gmra.mxu1 %vm197_vm1, %v3925_v25 }
 0x1a3   : > { %v1082_v23 = vpop.f32.mrf.mxu2 }
 0x1a4   : > { %v1142_v11 = vadd.f32 %v1082_v23, %v864_v20  ;;  %v1360_v59 = vpop.f32.mrf.mxu3  ;;  %v1641_v55 = vpop.f32.mrf.mxu0  ;;  %v4853_v20 = vld [vmem:[#allocation8_spill] sm:$0xff] }
 0x1a6   : > { %v1420_v50 = vadd.f32 %v1360_v59, %v1142_v11 }
 0x1a7   : > { %v810_v37 = vpop.f32.mrf.mxu1  ;;  %3316 = vmatmul.msk.f32.gmra.mxu0 %vm197_vm1, %v3951_v33 }
 0x1a8   : > { %v4398_v1 = vadd.f32 %v1638_v52, %v1420_v50  ;;  %3248 = vmatmul.msk.f32.gmra.mxu2 %vm197_vm1, %v3865_v6  ;;  %v588_v6 = vadd.f32 %v4126_v32, %v4849_v38  ;;  %v4851_v52 = vld [vmem:[#allocation13_spill] sm:$0xff]  ;;  %v1997_v50 = vld [vmem:[#allocation2 + $0x78] sm:$0xff] }
 0x1a9   : > { %3282 = vmatmul.msk.f32.gmra.mxu3 %vm197_vm1, %v3923_v24  ;;  %v4850_v24 = vld [vmem:[#allocation7_spill] sm:$0xff] }
 0x1aa   : > { %3215 = vmatmul.msk.f32.gmra.mxu1 %vm197_vm1, %v3937_v29  ;;  %v866_v29 = vadd.f32 %v810_v37, %v588_v6  ;;  %v1998_v6 = vld [vmem:[#allocation2 + $0x80] sm:$0xff] }
 0x1ab   : > { %v1085_v25 = vpop.f32.mrf.mxu2 }
 0x1ac   : > { %v1143_v58 = vadd.f32 %v1085_v25, %v865_v22  ;;  %v1363_v8 = vpop.f32.mrf.mxu3  ;;  %v1644_v0 = vpop.f32.mrf.mxu0  ;;  %v4854_v22 = vld [vmem:[#allocation16_spill] sm:$0xff]  ;;  %v4855_v25 = vld [vmem:[#allocation31_spill] sm:$0xff] }
 0x1ae   : > { %v1421_v17 = vadd.f32 %v1363_v8, %v1143_v58  ;;  %v590_v58 = vadd.f32 %v4126_v32, %v4855_v25 }
 0x1af   : > { %v813_v14 = vpop.f32.mrf.mxu1  ;;  %3317 = vmatmul.msk.f32.gmra.mxu0 %vm197_vm1, %v4848_v51 }
 0x1b0   : > { %v4410_v9 = vadd.f32 %v1641_v55, %v1421_v17  ;;  %3249 = vmatmul.msk.f32.gmra.mxu2 %vm197_vm1, %v1995_v19 }
 0x1b1   : > { %3283 = vmatmul.msk.f32.gmra.mxu3 %vm197_vm1, %v4850_v24 }
 0x1b2   : > { %3216 = vmatmul.msk.f32.gmra.mxu1 %vm197_vm1, %v3951_v33  ;;  %v867_v33 = vadd.f32 %v813_v14, %v589_v15 }
 0x1b3   : > { %v1088_v36 = vpop.f32.mrf.mxu2 }
 0x1b4   : > { %v1144_v7 = vadd.f32 %v1088_v36, %v866_v29  ;;  %v1366_v39 = vpop.f32.mrf.mxu3  ;;  %v1647_v18 = vpop.f32.mrf.mxu0  ;;  %v4857_v36 = vld [vmem:[#allocation19_spill] sm:$0xff] }
 0x1b6   : > { %v1422_v2 = vadd.f32 %v1366_v39, %v1144_v7  ;;  %v4858_v7 = vld [vmem:[#allocation35_spill] sm:$0xff] }
 0x1b7   : > { %v816_v4 = vpop.f32.mrf.mxu1  ;;  %3318 = vmatmul.msk.f32.gmra.mxu0 %vm197_vm1, %v4851_v52  ;;  %v591_v39 = vadd.f32 %v4126_v32, %v4858_v7 }
 0x1b8   : > { %v4421_v30 = vadd.f32 %v1644_v0, %v1422_v2  ;;  %3250 = vmatmul.msk.f32.gmra.mxu2 %vm197_vm1, %v1996_v21  ;;  %v4856_v0 = vld [vmem:[#allocation9_spill] sm:$0xff]  ;;  %v868_v19 = vadd.f32 %v816_v4, %v590_v58  ;;  %v4859_v21 = vld [vmem:[#allocation12_spill] sm:$0xff] }
 0x1b9   : > { %3284 = vmatmul.msk.f32.gmra.mxu3 %vm197_vm1, %v4853_v20  ;;  %v1999_v20 = vld [vmem:[#allocation2 + $0x90] sm:$0xff] }
 0x1ba   : > { %3217 = vmatmul.msk.f32.gmra.mxu1 %vm197_vm1, %v4848_v51 }
 0x1bb   : > { %v1091_v23 = vpop.f32.mrf.mxu2 }
 0x1bc   : > { %v1145_v11 = vadd.f32 %v1091_v23, %v867_v33  ;;  %v1369_v59 = vpop.f32.mrf.mxu3  ;;  %v1650_v55 = vpop.f32.mrf.mxu0 }
 0x1be   : > { %v1423_v37 = vadd.f32 %v1369_v59, %v1145_v11  ;;  %v4860_v11 = vld [vmem:[#allocation22_spill] sm:$0xff]  ;;  %v4861_v59 = vld [vmem:[#allocation11_spill] sm:$0xff] }
 0x1bf   : > { %v819_v40 = vpop.f32.mrf.mxu1  ;;  %3319 = vmatmul.msk.f32.gmra.mxu0 %vm197_vm1, %v4854_v22 }
 0x1c0   : > { %v4432_v8 = vadd.f32 %v1647_v18, %v1423_v37  ;;  %3251 = vmatmul.msk.f32.gmra.mxu2 %vm197_vm1, %v1997_v50  ;;  %v869_v2 = vadd.f32 %v819_v40, %v591_v39  ;;  %v4862_v37 = vld [vmem:[#allocation15_spill] sm:$0xff] }
 0x1c1   : > { %3285 = vmatmul.msk.f32.gmra.mxu3 %vm197_vm1, %v4856_v0 }
 0x1c2   : > { %3218 = vmatmul.msk.f32.gmra.mxu1 %vm197_vm1, %v4851_v52 }
 0x1c3   : > { %v1094_v17 = vpop.f32.mrf.mxu2 }
 0x1c4   : > { %v1146_v14 = vadd.f32 %v1094_v17, %v868_v19  ;;  %v1372_v51 = vpop.f32.mrf.mxu3  ;;  %v1653_v38 = vpop.f32.mrf.mxu0  ;;  %v2000_v19 = vld [vmem:[#allocation2 + $0x98] sm:$0xff] }
 0x1c6   : > { %v1424_v24 = vadd.f32 %v1372_v51, %v1146_v14  ;;  %v4863_v51 = vld [vmem:[#allocation26_spill] sm:$0xff] }
 0x1c7   : > { %v822_v29 = vpop.f32.mrf.mxu1  ;;  %3320 = vmatmul.msk.f32.gmra.mxu0 %vm197_vm1, %v4857_v36 }
 0x1c8   : > { %v4443_v18 = vadd.f32 %v1650_v55, %v1424_v24  ;;  %3252 = vmatmul.msk.f32.gmra.mxu2 %vm197_vm1, %v1998_v6  ;;  %v592_v55 = vadd.f32 %v4126_v32, %v4861_v59 }
 0x1c9   : > { %3286 = vmatmul.msk.f32.gmra.mxu3 %vm197_vm1, %v4859_v21 }
 0x1ca   : > { %3219 = vmatmul.msk.f32.gmra.mxu1 %vm197_vm1, %v4854_v22  ;;  %v870_v40 = vadd.f32 %v822_v29, %v592_v55  ;;  %v4865_v29 = vld [vmem:[#allocation18_spill] sm:$0xff] }
 0x1cb   : > { %v1097_v4 = vpop.f32.mrf.mxu2 }
 0x1cc   : > { %v1147_v52 = vadd.f32 %v1097_v4, %v869_v2  ;;  %v1375_v10 = vpop.f32.mrf.mxu3  ;;  %v1656_v15 = vpop.f32.mrf.mxu0  ;;  %v2001_v4 = vld [vmem:[#allocation2 + $0xa8] sm:$0xff] }
 0x1ce   : > { %v1425_v33 = vadd.f32 %v1375_v10, %v1147_v52 }
 0x1cf   : > { %v825_v23 = vpop.f32.mrf.mxu1  ;;  %3321 = vmatmul.msk.f32.gmra.mxu0 %vm197_vm1, %v4860_v11 }
 0x1d0   : > { %v4454_v50 = vadd.f32 %v1653_v38, %v1425_v33  ;;  %3253 = vmatmul.msk.f32.gmra.mxu2 %vm197_vm1, %v1999_v20  ;;  %v4864_v38 = vld [vmem:[#allocation14_spill] sm:$0xff] }
 0x1d1   : > { %3287 = vmatmul.msk.f32.gmra.mxu3 %vm197_vm1, %v4862_v37  ;;  %v593_v6 = vadd.f32 %v4126_v32, %v4864_v38  ;;  %v4866_v20 = vld [vmem:[#allocation30_spill] sm:$0xff] }
 0x1d2   : > { %3220 = vmatmul.msk.f32.gmra.mxu1 %vm197_vm1, %v4857_v36 }
 0x1d3   : > { %v1100_v22 = vpop.f32.mrf.mxu2  ;;  %v871_v36 = vadd.f32 %v825_v23, %v593_v6  ;;  %v4868_v23 = vld [vmem:[#allocation21_spill] sm:$0xff] }
 0x1d4   : > { %v1148_v25 = vadd.f32 %v1100_v22, %v870_v40  ;;  %v1378_v58 = vpop.f32.mrf.mxu3  ;;  %v1659_v0 = vpop.f32.mrf.mxu0 }
 0x1d6   : > { %v1426_v17 = vadd.f32 %v1378_v58, %v1148_v25  ;;  %v2002_v25 = vld [vmem:[#allocation2 + $0xb0] sm:$0xff] }
 0x1d7   : > { %v828_v14 = vpop.f32.mrf.mxu1  ;;  %3322 = vmatmul.msk.f32.gmra.mxu0 %vm197_vm1, %v4863_v51 }
 0x1d8   : > { %v4465_v24 = vadd.f32 %v1656_v15, %v1426_v17  ;;  %3254 = vmatmul.msk.f32.gmra.mxu2 %vm197_vm1, %v2000_v19  ;;  %v4867_v15 = vld [vmem:[#allocation17_spill] sm:$0xff]  ;;  %v4869_v17 = vld [vmem:[#allocation34_spill] sm:$0xff] }
 0x1d9   : > { %3288 = vmatmul.msk.f32.gmra.mxu3 %vm197_vm1, %v4865_v29  ;;  %v594_v33 = vadd.f32 %v4126_v32, %v4867_v15  ;;  %v4872_v15 = vld [vmem:[#allocation37_spill] sm:$0xff] }
 0x1da   : > { %3221 = vmatmul.msk.f32.gmra.mxu1 %vm197_vm1, %v4860_v11 }
 0x1db   : > { %v1103_v7 = vpop.f32.mrf.mxu2  ;;  %v872_v11 = vadd.f32 %v828_v14, %v594_v33  ;;  %v4871_v14 = vld [vmem:[#allocation25_spill] sm:$0xff] }
 0x1dc   : > { %v1149_v39 = vadd.f32 %v1103_v7, %v871_v36  ;;  %v1381_v21 = vpop.f32.mrf.mxu3  ;;  %v1662_v2 = vpop.f32.mrf.mxu0 }
 0x1de   : > { %v1427_v52 = vadd.f32 %v1381_v21, %v1149_v39  ;;  %v2003_v21 = vld [vmem:[#allocation2 + $0xc0] sm:$0xff] }
 0x1df   : > { %v831_v10 = vpop.f32.mrf.mxu1  ;;  %3323 = vmatmul.msk.f32.gmra.mxu0 %vm197_vm1, %v4866_v20 }
 0x1e0   : > { %v4476_v59 = vadd.f32 %v1659_v0, %v1427_v52  ;;  %3255 = vmatmul.msk.f32.gmra.mxu2 %vm197_vm1, %v2001_v4  ;;  %v4870_v0 = vld [vmem:[#allocation20_spill] sm:$0xff] }
 0x1e1   : > { %3289 = vmatmul.msk.f32.gmra.mxu3 %vm197_vm1, %v4868_v23  ;;  %v595_v38 = vadd.f32 %v4126_v32, %v4870_v0 }
 0x1e2   : > { %3222 = vmatmul.msk.f32.gmra.mxu1 %vm197_vm1, %v4863_v51 }
 0x1e3   : > { %v1106_v55 = vpop.f32.mrf.mxu2  ;;  %v873_v51 = vadd.f32 %v831_v10, %v595_v38  ;;  %v4874_v10 = vld [vmem:[#allocation29_spill] sm:$0xff] }
 0x1e4   : > { %v1150_v37 = vadd.f32 %v1106_v55, %v872_v11  ;;  %v1384_v40 = vpop.f32.mrf.mxu3  ;;  %v1665_v22 = vpop.f32.mrf.mxu0 }
 0x1e6   : > { %v1428_v58 = vadd.f32 %v1384_v40, %v1150_v37 }
 0x1e7   : > { %v834_v19 = vpop.f32.mrf.mxu1  ;;  %3324 = vmatmul.msk.f32.gmra.mxu0 %vm197_vm1, %v4869_v17 }
 0x1e8   : > { %v4487_v6 = vadd.f32 %v1662_v2, %v1428_v58  ;;  %3256 = vmatmul.msk.f32.gmra.mxu2 %vm197_vm1, %v2002_v25  ;;  %v4873_v2 = vld [vmem:[#allocation24_spill] sm:$0xff]  ;;  %v2004_v25 = vld [vmem:[#allocation2 + $0xc8] sm:$0xff] }
 0x1e9   : > { %3290 = vmatmul.msk.f32.gmra.mxu3 %vm197_vm1, %v4871_v14  ;;  %v596_v33 = vadd.f32 %v4126_v32, %v4873_v2 }
 0x1ea   : > { %3223 = vmatmul.msk.f32.gmra.mxu1 %vm197_vm1, %v4866_v20 }
 0x1eb   : > { %v1109_v29 = vpop.f32.mrf.mxu2  ;;  %v874_v20 = vadd.f32 %v834_v19, %v596_v33  ;;  %v4876_v19 = vld [vmem:[#allocation33_spill] sm:$0xff] }
 0x1ec   : > { %v1151_v36 = vadd.f32 %v1109_v29, %v873_v51  ;;  %v1387_v7 = vpop.f32.mrf.mxu3  ;;  %v1668_v39 = vpop.f32.mrf.mxu0 }
 0x1ee   : > { %v1429_v4 = vadd.f32 %v1387_v7, %v1151_v36 }
 0x1ef   : > { %v837_v52 = vpop.f32.mrf.mxu1  ;;  %3325 = vmatmul.msk.f32.gmra.mxu0 %vm197_vm1, %v4872_v15 }
 0x1f0   : > { %v4498_v23 = vadd.f32 %v1665_v22, %v1429_v4  ;;  %3257 = vmatmul.msk.f32.gmra.mxu2 %vm197_vm1, %v2003_v21  ;;  %v4875_v22 = vld [vmem:[#allocation28_spill] sm:$0xff] }
 0x1f1   : > { %3291 = vmatmul.msk.f32.gmra.mxu3 %vm197_vm1, %v4874_v10  ;;  %v597_v38 = vadd.f32 %v4126_v32, %v4875_v22  ;;  %v2005_v21 = vld [vmem:[#allocation2 + $0xd8] sm:$0xff] }
 0x1f2   : > { %3224 = vmatmul.msk.f32.gmra.mxu1 %vm197_vm1, %v4869_v17 }
 0x1f3   : > { %v1112_v11 = vpop.f32.mrf.mxu2  ;;  %v875_v17 = vadd.f32 %v837_v52, %v597_v38 }
 0x1f4   : > { %v1152_v55 = vadd.f32 %v1112_v11, %v874_v20  ;;  %v1390_v37 = vpop.f32.mrf.mxu3  ;;  %v1671_v40 = vpop.f32.mrf.mxu0 }
 0x1f6   : > { %v1430_v58 = vadd.f32 %v1390_v37, %v1152_v55  ;;  %v2006_v37 = vld [vmem:[#allocation2 + $0xe0] sm:$0xff] }
 0x1f7   : > { %v840_v0 = vpop.f32.mrf.mxu1  ;;  %3326 = vmatmul.msk.f32.gmra.mxu0 %vm197_vm1, %v4140_v56 }
 0x1f8   : > { %v4509_v14 = vadd.f32 %v1668_v39, %v1430_v58  ;;  %3258 = vmatmul.msk.f32.gmra.mxu2 %vm197_vm1, %v2004_v25  ;;  %v4877_v39 = vld [vmem:[#allocation32_spill] sm:$0xff] }
 0x1f9   : > { %3292 = vmatmul.msk.f32.gmra.mxu3 %vm197_vm1, %v4876_v19  ;;  %v598_v33 = vadd.f32 %v4126_v32, %v4877_v39  ;;  %v2008_v39 = vld [vmem:[#allocation2 + $0xf8] sm:$0xff] }
 0x1fa   : > { %3225 = vmatmul.msk.f32.gmra.mxu1 %vm197_vm1, %v4872_v15 }
 0x1fb   : > { %v1115_v51 = vpop.f32.mrf.mxu2  ;;  %v876_v52 = vadd.f32 %v840_v0, %v598_v33 }
 0x1fc   : > { %v1153_v29 = vadd.f32 %v1115_v51, %v875_v17  ;;  %v1393_v36 = vpop.f32.mrf.mxu3  ;;  %v1674_v7 = vpop.f32.mrf.mxu0  ;;  %v2007_v51 = vld [vmem:[#allocation2 + $0xf0] sm:$0xff] }
 0x1fe   : > { %v1431_v4 = vadd.f32 %v1393_v36, %v1153_v29 }
 0x1ff   : > { %v843_v2 = vpop.f32.mrf.mxu1  ;;  %3327 = vmatmul.msk.f32.gmra.mxu0 %vm197_vm1, %v4156_v5 }
 0x200   : > { %v4520_v10 = vadd.f32 %v1671_v40, %v1431_v4  ;;  %3259 = vmatmul.msk.f32.gmra.mxu2 %vm197_vm1, %v2005_v21  ;;  %v4878_v40 = vld [vmem:[#allocation36_spill] sm:$0xff] }
 0x201   : > { %3293 = vmatmul.msk.f32.gmra.mxu3 %vm197_vm1, %v4119_v42  ;;  %v599_v22 = vadd.f32 %v4126_v32, %v4878_v40 }
 0x202   : > { %3226 = vmatmul.msk.f32.gmra.mxu1 %vm197_vm1, %v4140_v56 }
 0x203   : > { %v1118_v15 = vpop.f32.mrf.mxu2  ;;  %v877_v42 = vadd.f32 %v843_v2, %v599_v22  ;;  %v2009_v22 = vld [vmem:[#allocation2 + $0x108] sm:$0xff] }
 0x204   : > { %v1154_v20 = vadd.f32 %v1118_v15, %v876_v52  ;;  %v1396_v11 = vpop.f32.mrf.mxu3  ;;  %v1677_v55 = vpop.f32.mrf.mxu0  ;;  %v4551_v52 = vstv %s2825_s8 }
 0x206   : > { %v1432_v25 = vadd.f32 %v1396_v11, %v1154_v20 }
 0x207   : > { %v1862_v58 = vpop.f32.mrf.mxu1  ;;  %3328 = vmatmul.msk.f32.gmra.mxu0 %vm197_vm1, %v4172_v49 }
 0x208   : > { %v4531_v38 = vadd.f32 %v1674_v7, %v1432_v25  ;;  %3260 = vmatmul.msk.f32.gmra.mxu2 %vm197_vm1, %v2006_v37 }
 0x209   : > { %3294 = vmatmul.msk.f32.gmra.mxu3 %vm197_vm1, %v4138_v27  ;;  %v4879_v27 = vld [vmem:[#allocation38_spill] sm:$0xff] }
 0x20a   : > { %3227 = vmatmul.msk.f32.gmra.mxu1 %vm197_vm1, %v4156_v5  ;;  %v1958_v5 = vadd.f32 %v1862_v58, %v4879_v27 }
 0x20b   : > { %v1121_v56 = vpop.f32.mrf.mxu2 }
 0x20c   : > { %v1155_v0 = vadd.f32 %v1121_v56, %v877_v42  ;;  %v1399_v19 = vpop.f32.mrf.mxu3  ;;  %v2697_v17 = vpop.f32.mrf.mxu0 }
 0x20e   : > { %v1433_v29 = vadd.f32 %v1399_v19, %v1155_v0 }
 0x20f   : > { %v1865_v32 = vpop.f32.mrf.mxu1  ;;  %3329 = vmatmul.msk.f32.gmra.mxu0 %vm197_vm1, %v4188_v3 }
 0x210   : > { %v4540_v36 = vadd.f32 %v1677_v55, %v1433_v29  ;;  %3261 = vmatmul.msk.f32.gmra.mxu2 %vm197_vm1, %v2007_v51 }
 0x211   : > { %3295 = vmatmul.msk.f32.gmra.mxu3 %vm197_vm1, %v4154_v47 }
 0x212   : > { %3228 = vmatmul.msk.f32.gmra.mxu1 %vm197_vm1, %v4172_v49  ;;  %v4880_v49 = vld [vmem:[#allocation39_spill] sm:$0xff] }
 0x213   : > { %v2141_v7 = vpop.f32.mrf.mxu2  ;;  %v1959_v20 = vadd.f32 %v1865_v32, %v4880_v49 }
 0x214   : > { %v2237_v21 = vadd.f32 %v2141_v7, %v1958_v5  ;;  %v2419_v4 = vpop.f32.mrf.mxu3  ;;  %v2700_v2 = vpop.f32.mrf.mxu0  ;;  %v2010_v5 = vld [vmem:[#allocation2 + $0x110] sm:$0xff] }
 0x216   : > { %v2515_v33 = vadd.f32 %v2419_v4, %v2237_v21 }
 0x217   : > { %v1868_v15 = vpop.f32.mrf.mxu1  ;;  %3330 = vmatmul.msk.f32.gmra.mxu0 %vm197_vm1, %v4204_v34 }
 0x218   : > { %v2793_v47 = vadd.f32 %v2697_v17, %v2515_v33  ;;  %3262 = vmatmul.msk.f32.gmra.mxu2 %vm197_vm1, %v2008_v39 }
 0x219   : > { %3296 = vmatmul.msk.f32.gmra.mxu3 %vm197_vm1, %v4170_v13 }
 0x21a   : > { %vm2826_vm3 = vcmp.ge.f32.partialorder %v2793_v47, 0.0  ;;  %v2859_v11 = vmul.f32 %v4551_v52, %v2793_v47  ;;  %3229 = vmatmul.msk.f32.gmra.mxu1 %vm197_vm1, %v4188_v3  ;;  %v4881_v3 = vld [vmem:[#allocation40_spill] sm:$0xff] }
 0x21b   : > { %v2144_v55 = vpop.f32.mrf.mxu2  ;;  %v1960_v0 = vadd.f32 %v1868_v15, %v4881_v3 }
 0x21c   : > { %v2891_v37 = vsel %vm2826_vm3, %v2793_v47, %v2859_v11  ;;  %v2238_v25 = vadd.f32 %v2144_v55, %v1959_v20  ;;  %v2422_v58 = vpop.f32.mrf.mxu3  ;;  %v2703_v40 = vpop.f32.mrf.mxu0  ;;  %v2011_v20 = vld [vmem:[#allocation2 + $0x120] sm:$0xff] }
 0x21d   : > { %2923 = vst [vmem:[%s4562_s12] sm:$0xff] %v2891_v37 }
 0x21e   : > { %v2516_v13 = vadd.f32 %v2422_v58, %v2238_v25 }
 0x21f   : > { %v1871_v42 = vpop.f32.mrf.mxu1  ;;  %3331 = vmatmul.msk.f32.gmra.mxu0 %vm197_vm1, %v4220_v41 }
 0x220   : > { %v2794_v56 = vadd.f32 %v2700_v2, %v2516_v13  ;;  %3263 = vmatmul.msk.f32.gmra.mxu2 %vm197_vm1, %v2009_v22 }
 0x221   : > { %3297 = vmatmul.msk.f32.gmra.mxu3 %vm197_vm1, %v4186_v16 }
 0x222   : > { %vm2827_vm4 = vcmp.ge.f32.partialorder %v2794_v56, 0.0  ;;  %v2860_v19 = vmul.f32 %v4551_v52, %v2794_v56  ;;  %3230 = vmatmul.msk.f32.gmra.mxu1 %vm197_vm1, %v4204_v34  ;;  %v4882_v34 = vld [vmem:[#allocation41_spill] sm:$0xff] }
 0x223   : > { %v2147_v17 = vpop.f32.mrf.mxu2  ;;  %v1961_v4 = vadd.f32 %v1871_v42, %v4882_v34 }
 0x224   : > { %v2892_v51 = vsel %vm2827_vm4, %v2794_v56, %v2860_v19  ;;  %v2239_v29 = vadd.f32 %v2147_v17, %v1960_v0  ;;  %v2425_v32 = vpop.f32.mrf.mxu3  ;;  %v2706_v27 = vpop.f32.mrf.mxu0  ;;  %v2012_v56 = vld [vmem:[#allocation2 + $0x128] sm:$0xff] }
 0x225   : > { %2924 = vst [vmem:[%s4562_s12 + $0x8] sm:$0xff] %v2892_v51 }
 0x226   : > { %v2517_v7 = vadd.f32 %v2425_v32, %v2239_v29 }
 0x227   : > { %v1874_v21 = vpop.f32.mrf.mxu1  ;;  %3332 = vmatmul.msk.f32.gmra.mxu0 %vm197_vm1, %v4236_v46 }
 0x228   : > { %v2795_v16 = vadd.f32 %v2703_v40, %v2517_v7  ;;  %3264 = vmatmul.msk.f32.gmra.mxu2 %vm197_vm1, %v2010_v5 }
 0x229   : > { %3298 = vmatmul.msk.f32.gmra.mxu3 %vm197_vm1, %v4202_v35 }
 0x22a   : > { %vm2828_vm5 = vcmp.ge.f32.partialorder %v2795_v16, 0.0  ;;  %v2861_v2 = vmul.f32 %v4551_v52, %v2795_v16  ;;  %3231 = vmatmul.msk.f32.gmra.mxu1 %vm197_vm1, %v4220_v41  ;;  %v4883_v41 = vld [vmem:[#allocation42_spill] sm:$0xff] }
 0x22b   : > { %v2150_v39 = vpop.f32.mrf.mxu2  ;;  %v1962_v37 = vadd.f32 %v1874_v21, %v4883_v41 }
 0x22c   : > { %v2893_v33 = vsel %vm2828_vm5, %v2795_v16, %v2861_v2  ;;  %v2240_v15 = vadd.f32 %v2150_v39, %v1961_v4  ;;  %v2428_v47 = vpop.f32.mrf.mxu3  ;;  %v2709_v49 = vpop.f32.mrf.mxu0  ;;  %v1735_v16 = vld [vmem:[#allocation2 + $0x12a] sm:$0xff] }
 0x22d   : > { %2925 = vst [vmem:[%s4562_s12 + $0x10] sm:$0xff] %v2893_v33 }
 0x22e   : > { %v2518_v11 = vadd.f32 %v2428_v47, %v2240_v15 }
 0x22f   : > { %v1877_v55 = vpop.f32.mrf.mxu1  ;;  %3333 = vmatmul.msk.f32.gmra.mxu0 %vm197_vm1, %v4252_v26 }
 0x230   : > { %v2796_v35 = vadd.f32 %v2706_v27, %v2518_v11  ;;  %3265 = vmatmul.msk.f32.gmra.mxu2 %vm197_vm1, %v2011_v20  ;;  %v1736_v20 = vld [vmem:[#allocation2 + $0x13a] sm:$0xff] }
 0x231   : > { %3299 = vmatmul.msk.f32.gmra.mxu3 %vm197_vm1, %v4218_v48  ;;  %v4885_v11 = vld [vmem:[#allocation49_spill] sm:$0xff] }
 0x232   : > { %vm2829_vm6 = vcmp.ge.f32.partialorder %v2796_v35, 0.0  ;;  %v2862_v25 = vmul.f32 %v4551_v52, %v2796_v35  ;;  %3232 = vmatmul.msk.f32.gmra.mxu1 %vm197_vm1, %v4236_v46  ;;  %v4884_v46 = vld [vmem:[#allocation43_spill] sm:$0xff] }
 0x233   : > { %v2153_v58 = vpop.f32.mrf.mxu2  ;;  %v1963_v19 = vadd.f32 %v1877_v55, %v4884_v46  ;;  %v4887_v55 = vld [vmem:[#allocation44_spill] sm:$0xff]  ;;  %v4888_v46 = vld [vmem:[#allocation47_spill] sm:$0xff] }
 0x234   : > { %v2894_v40 = vsel %vm2829_vm6, %v2796_v35, %v2862_v25  ;;  %v2241_v22 = vadd.f32 %v2153_v58, %v1962_v37  ;;  %v2431_v13 = vpop.f32.mrf.mxu3  ;;  %v2712_v42 = vpop.f32.mrf.mxu0 }
 0x235   : > { %2926 = vst [vmem:[%s4562_s12 + $0x18] sm:$0xff] %v2894_v40 }
 0x236   : > { %v2519_v3 = vadd.f32 %v2431_v13, %v2241_v22  ;;  %v2571_v13 = vld [vmem:[#allocation2 + $0x152] sm:$0xff] }
 0x237   : > { %v1880_v0 = vpop.f32.mrf.mxu1  ;;  %3334 = vmatmul.msk.f32.gmra.mxu0 %vm197_vm1, %v4268_v31  ;;  %v2013_v31 = vld [vmem:[#allocation2 + $0x138] sm:$0xff] }
 0x238   : > { %v2797_v48 = vadd.f32 %v2709_v49, %v2519_v3  ;;  %3266 = vmatmul.msk.f32.gmra.mxu2 %vm197_vm1, %v2012_v56 }
 0x239   : > { %3300 = vmatmul.msk.f32.gmra.mxu3 %vm197_vm1, %v4234_v54 }
 0x23a   : > { %vm2830_vm7 = vcmp.ge.f32.partialorder %v2797_v48, 0.0  ;;  %v2863_v17 = vmul.f32 %v4551_v52, %v2797_v48  ;;  %3233 = vmatmul.msk.f32.gmra.mxu1 %vm197_vm1, %v4252_v26  ;;  %v1964_v26 = vadd.f32 %v1880_v0, %v4242_v63  ;;  %v1737_v0 = vld [vmem:[#allocation2 + $0x142] sm:$0xff] }
 0x23b   : > { %v2156_v51 = vpop.f32.mrf.mxu2 }
 0x23c   : > { %v2895_v29 = vsel %vm2830_vm7, %v2797_v48, %v2863_v17  ;;  %v2242_v32 = vadd.f32 %v2156_v51, %v1963_v19  ;;  %v2434_v27 = vpop.f32.mrf.mxu3  ;;  %v2715_v5 = vpop.f32.mrf.mxu0  ;;  %v4889_v19 = vld [vmem:[#allocation46_spill] sm:$0xff] }
 0x23d   : > { %2927 = vst [vmem:[%s4562_s12 + $0x20] sm:$0xff] %v2895_v29 }
 0x23e   : > { %v2520_v7 = vadd.f32 %v2434_v27, %v2242_v32 }
 0x23f   : > { %v1883_v21 = vpop.f32.mrf.mxu1  ;;  %3335 = vmatmul.msk.f32.gmra.mxu0 %vm197_vm1, %v4286_v43  ;;  %v2014_v43 = vld [vmem:[#allocation2 + $0x140] sm:$0xff] }
 0x240   : > { %v2798_v54 = vadd.f32 %v2712_v42, %v2520_v7  ;;  %3267 = vmatmul.msk.f32.gmra.mxu2 %vm197_vm1, %v2013_v31  ;;  %v1965_v35 = vadd.f32 %v1883_v21, %v4887_v55  ;;  %v2015_v42 = vld [vmem:[#allocation2 + $0x150] sm:$0xff]  ;;  %v2572_v7 = vld [vmem:[#allocation2 + $0x15a] sm:$0xff] }
 0x241   : > { %3301 = vmatmul.msk.f32.gmra.mxu3 %vm197_vm1, %v4250_v61  ;;  %v4886_v61 = vld [vmem:[#allocation45_spill] sm:$0xff]  ;;  %v2016_v21 = vld [vmem:[#allocation2 + $0x158] sm:$0xff] }
 0x242   : > { %vm2831_vm8 = vcmp.ge.f32.partialorder %v2798_v54, 0.0  ;;  %v2864_v34 = vmul.f32 %v4551_v52, %v2798_v54  ;;  %3234 = vmatmul.msk.f32.gmra.mxu1 %vm197_vm1, %v1735_v16 }
 0x243   : > { %v2159_v4 = vpop.f32.mrf.mxu2 }
 0x244   : > { %v2896_v2 = vsel %vm2831_vm8, %v2798_v54, %v2864_v34  ;;  %v2243_v39 = vadd.f32 %v2159_v4, %v1964_v26  ;;  %v2437_v33 = vpop.f32.mrf.mxu3  ;;  %v2718_v15 = vpop.f32.mrf.mxu0  ;;  %v4890_v34 = vld [vmem:[#allocation48_spill] sm:$0xff] }
 0x245   : > { %2928 = vst [vmem:[%s4562_s12 + $0x28] sm:$0xff] %v2896_v2 }
 0x246   : > { %v2521_v47 = vadd.f32 %v2437_v33, %v2243_v39 }
 0x247   : > { %v1886_v49 = vpop.f32.mrf.mxu1  ;;  %3336 = vmatmul.msk.f32.gmra.mxu0 %vm197_vm1, %v4885_v11 }
 0x248   : > { %v2799_v63 = vadd.f32 %v2715_v5, %v2521_v47  ;;  %3268 = vmatmul.msk.f32.gmra.mxu2 %vm197_vm1, %v2014_v43  ;;  %v1966_v17 = vadd.f32 %v1886_v49, %v4889_v19  ;;  %v2573_v49 = vld [vmem:[#allocation2 + $0x16a] sm:$0xff] }
 0x249   : > { %3302 = vmatmul.msk.f32.gmra.mxu3 %vm197_vm1, %v4886_v61  ;;  %v4891_v61 = vld [vmem:[#allocation50_spill] sm:$0xff] }
 0x24a   : > { %vm2832_vm9 = vcmp.ge.f32.partialorder %v2799_v63, 0.0  ;;  %v2865_v41 = vmul.f32 %v4551_v52, %v2799_v63  ;;  %3235 = vmatmul.msk.f32.gmra.mxu1 %vm197_vm1, %v1736_v20  ;;  %v2017_v20 = vld [vmem:[#allocation2 + $0x168] sm:$0xff] }
 0x24b   : > { %v2162_v37 = vpop.f32.mrf.mxu2 }
 0x24c   : > { %v2897_v25 = vsel %vm2832_vm9, %v2799_v63, %v2865_v41  ;;  %v2244_v58 = vadd.f32 %v2162_v37, %v1965_v35  ;;  %v2440_v40 = vpop.f32.mrf.mxu3  ;;  %v2721_v22 = vpop.f32.mrf.mxu0 }
 0x24d   : > { %2929 = vst [vmem:[%s4562_s12 + $0x30] sm:$0xff] %v2897_v25 }
 0x24e   : > { %v2522_v56 = vadd.f32 %v2440_v40, %v2244_v58 }
 0x24f   : > { %v1889_v3 = vpop.f32.mrf.mxu1  ;;  %3337 = vmatmul.msk.f32.gmra.mxu0 %vm197_vm1, %v2571_v13 }
 0x250   : > { %v2800_v48 = vadd.f32 %v2718_v15, %v2522_v56  ;;  %3269 = vmatmul.msk.f32.gmra.mxu2 %vm197_vm1, %v2015_v42  ;;  %v1967_v4 = vadd.f32 %v1889_v3, %v4890_v34  ;;  %v2296_v56 = vld [vmem:[#allocation2 + $0x171] sm:$0xff] }
 0x251   : > { %3303 = vmatmul.msk.f32.gmra.mxu3 %vm197_vm1, %v4888_v46 }
 0x252   : > { %vm2833_vm10 = vcmp.ge.f32.partialorder %v2800_v48, 0.0  ;;  %v2866_v51 = vmul.f32 %v4551_v52, %v2800_v48  ;;  %3236 = vmatmul.msk.f32.gmra.mxu1 %vm197_vm1, %v1737_v0 }
 0x253   : > { %v2165_v29 = vpop.f32.mrf.mxu2 }
 0x254   : > { %v2898_v32 = vsel %vm2833_vm10, %v2800_v48, %v2866_v51  ;;  %v2245_v27 = vadd.f32 %v2165_v29, %v1966_v17  ;;  %v2443_v5 = vpop.f32.mrf.mxu3  ;;  %v2724_v31 = vpop.f32.mrf.mxu0 }
 0x255   : > { %2930 = vst [vmem:[%s4562_s12 + $0x38] sm:$0xff] %v2898_v32  ;;  %v2575_v32 = vld [vmem:[#allocation2 + $0x182] sm:$0xff] }
 0x256   : > { %v2523_v16 = vadd.f32 %v2443_v5, %v2245_v27  ;;  %v2019_v27 = vld [vmem:[#allocation2 + $0x180] sm:$0xff] }
 0x257   : > { %v1892_v54 = vpop.f32.mrf.mxu1  ;;  %3338 = vmatmul.msk.f32.gmra.mxu0 %vm197_vm1, %v2572_v7 }
 0x258   : > { %v2801_v26 = vadd.f32 %v2721_v22, %v2523_v16  ;;  %3270 = vmatmul.msk.f32.gmra.mxu2 %vm197_vm1, %v2016_v21  ;;  %v1968_v55 = vadd.f32 %v1892_v54, %v4891_v61  ;;  %v2574_v22 = vld [vmem:[#allocation2 + $0x172] sm:$0xff] }
 0x259   : > { %3304 = vmatmul.msk.f32.gmra.mxu3 %vm197_vm1, %v4302_v44  ;;  %v4892_v21 = vld [vmem:[#allocation51_spill] sm:$0xff] }
 0x25a   : > { %vm2834_vm11 = vcmp.ge.f32.partialorder %v2801_v26, 0.0  ;;  %v2867_v2 = vmul.f32 %v4551_v52, %v2801_v26  ;;  %3237 = vmatmul.msk.f32.gmra.mxu1 %vm197_vm1, %v2571_v13  ;;  %v2018_v13 = vld [vmem:[#allocation2 + $0x170] sm:$0xff] }
 0x25b   : > { %v2168_v39 = vpop.f32.mrf.mxu2 }
 0x25c   : > { %v2899_v33 = vsel %vm2834_vm11, %v2801_v26, %v2867_v2  ;;  %v2246_v15 = vadd.f32 %v2168_v39, %v1967_v4  ;;  %v2446_v43 = vpop.f32.mrf.mxu3  ;;  %v2727_v47 = vpop.f32.mrf.mxu0 }
 0x25d   : > { %2931 = vst [vmem:[%s4562_s12 + $0x40] sm:$0xff] %v2899_v33  ;;  %v2576_v33 = vld [vmem:[#allocation2 + $0x18a] sm:$0xff] }
 0x25e   : > { %v2524_v11 = vadd.f32 %v2446_v43, %v2246_v15  ;;  %v2020_v15 = vld [vmem:[#allocation2 + $0x188] sm:$0xff] }
 0x25f   : > { %v1895_v63 = vpop.f32.mrf.mxu1  ;;  %3339 = vmatmul.msk.f32.gmra.mxu0 %vm197_vm1, %v2573_v49 }
 0x260   : > { %v2802_v44 = vadd.f32 %v2724_v31, %v2524_v11  ;;  %3271 = vmatmul.msk.f32.gmra.mxu2 %vm197_vm1, %v2017_v20  ;;  %v1969_v0 = vadd.f32 %v1895_v63, %v4324_v62  ;;  %v2297_v31 = vld [vmem:[#allocation2 + $0x181] sm:$0xff] }
 0x261   : > { %3305 = vmatmul.msk.f32.gmra.mxu3 %vm197_vm1, %v4318_v57 }
 0x262   : > { %vm2835_vm12 = vcmp.ge.f32.partialorder %v2802_v44, 0.0  ;;  %v2868_v35 = vmul.f32 %v4551_v52, %v2802_v44  ;;  %3238 = vmatmul.msk.f32.gmra.mxu1 %vm197_vm1, %v2572_v7 }
 0x263   : > { %v2171_v41 = vpop.f32.mrf.mxu2 }
 0x264   : > { %v2900_v37 = vsel %vm2835_vm12, %v2802_v44, %v2868_v35  ;;  %v2247_v25 = vadd.f32 %v2171_v41, %v1968_v55  ;;  %v2449_v58 = vpop.f32.mrf.mxu3  ;;  %v2730_v40 = vpop.f32.mrf.mxu0 }
 0x265   : > { %2932 = vst [vmem:[%s4562_s12 + $0x48] sm:$0xff] %v2900_v37  ;;  %v2577_v37 = vld [vmem:[#allocation2 + $0x19a] sm:$0xff] }
 0x266   : > { %v2525_v42 = vadd.f32 %v2449_v58, %v2247_v25  ;;  %v2021_v25 = vld [vmem:[#allocation2 + $0x198] sm:$0xff] }
 0x267   : > { %v1898_v3 = vpop.f32.mrf.mxu1  ;;  %3340 = vmatmul.msk.f32.gmra.mxu0 %vm197_vm1, %v2574_v22 }
 0x268   : > { %v2803_v57 = vadd.f32 %v2727_v47, %v2525_v42  ;;  %3272 = vmatmul.msk.f32.gmra.mxu2 %vm197_vm1, %v2018_v13  ;;  %v1970_v16 = vadd.f32 %v1898_v3, %v4892_v21  ;;  %v2298_v47 = vld [vmem:[#allocation2 + $0x189] sm:$0xff] }
 0x269   : > { %3306 = vmatmul.msk.f32.gmra.mxu3 %vm197_vm1, %v2296_v56 }
 0x26a   : > { %vm2836_vm13 = vcmp.ge.f32.partialorder %v2803_v57, 0.0  ;;  %v2869_v48 = vmul.f32 %v4551_v52, %v2803_v57  ;;  %3239 = vmatmul.msk.f32.gmra.mxu1 %vm197_vm1, %v2573_v49 }
 0x26b   : > { %v2174_v46 = vpop.f32.mrf.mxu2 }
 0x26c   : > { %v2901_v19 = vsel %vm2836_vm13, %v2803_v57, %v2869_v48  ;;  %v2248_v17 = vadd.f32 %v2174_v46, %v1969_v0  ;;  %v2452_v51 = vpop.f32.mrf.mxu3  ;;  %v2733_v29 = vpop.f32.mrf.mxu0  ;;  %v2578_v46 = vld [vmem:[#allocation2 + $0x1a2] sm:$0xff] }
 0x26d   : > { %2933 = vst [vmem:[%s4562_s12 + $0x50] sm:$0xff] %v2901_v19  ;;  %v2022_v19 = vld [vmem:[#allocation2 + $0x1a0] sm:$0xff] }
 0x26e   : > { %v2526_v5 = vadd.f32 %v2452_v51, %v2248_v17  ;;  %v2300_v51 = vld [vmem:[#allocation2 + $0x1a1] sm:$0xff] }
 0x26f   : > { %v1901_v7 = vpop.f32.mrf.mxu1  ;;  %3341 = vmatmul.msk.f32.gmra.mxu0 %vm197_vm1, %v2575_v32 }
 0x270   : > { %v2804_v62 = vadd.f32 %v2730_v40, %v2526_v5  ;;  %3273 = vmatmul.msk.f32.gmra.mxu2 %vm197_vm1, %v2019_v27  ;;  %v1971_v11 = vadd.f32 %v1901_v7, %v4344_v12  ;;  %v2299_v40 = vld [vmem:[#allocation2 + $0x199] sm:$0xff] }
 0x271   : > { %3307 = vmatmul.msk.f32.gmra.mxu3 %vm197_vm1, %v2297_v31 }
 0x272   : > { %vm2837_vm14 = vcmp.ge.f32.partialorder %v2804_v62, 0.0  ;;  %v2870_v54 = vmul.f32 %v4551_v52, %v2804_v62  ;;  %3240 = vmatmul.msk.f32.gmra.mxu1 %vm197_vm1, %v2574_v22 }
 0x273   : > { %v2177_v26 = vpop.f32.mrf.mxu2 }
 0x274   : > { %v2902_v34 = vsel %vm2837_vm14, %v2804_v62, %v2870_v54  ;;  %v2249_v4 = vadd.f32 %v2177_v26, %v1970_v16  ;;  %v2455_v2 = vpop.f32.mrf.mxu3  ;;  %v2736_v39 = vpop.f32.mrf.mxu0 }
 0x275   : > { %2934 = vst [vmem:[%s4562_s12 + $0x58] sm:$0xff] %v2902_v34 }
 0x276   : > { %v2527_v43 = vadd.f32 %v2455_v2, %v2249_v4 }
 0x277   : > { %v1904_v49 = vpop.f32.mrf.mxu1  ;;  %3342 = vmatmul.msk.f32.gmra.mxu0 %vm197_vm1, %v2576_v33 }
 0x278   : > { %v2805_v20 = vadd.f32 %v2733_v29, %v2527_v43  ;;  %3274 = vmatmul.msk.f32.gmra.mxu2 %vm197_vm1, %v2020_v15  ;;  %v1972_v13 = vadd.f32 %v1904_v49, %v4352_v28 }
 0x279   : > { %3308 = vmatmul.msk.f32.gmra.mxu3 %vm197_vm1, %v2298_v47 }
 0x27a   : > { %vm2838_vm15 = vcmp.ge.f32.partialorder %v2805_v20, 0.0  ;;  %v2871_v63 = vmul.f32 %v4551_v52, %v2805_v20  ;;  %3241 = vmatmul.msk.f32.gmra.mxu1 %vm197_vm1, %v2575_v32 }
 0x27b   : > { %v2180_v44 = vpop.f32.mrf.mxu2 }
 0x27c   : > { %v2903_v61 = vsel %vm2838_vm15, %v2805_v20, %v2871_v63  ;;  %v2250_v55 = vadd.f32 %v2180_v44, %v1971_v11  ;;  %v2458_v35 = vpop.f32.mrf.mxu3  ;;  %v2739_v41 = vpop.f32.mrf.mxu0 }
 0x27d   : > { %2935 = vst [vmem:[%s4562_s12 + $0x60] sm:$0xff] %v2903_v61 }
 0x27e   : > { %v2528_v58 = vadd.f32 %v2458_v35, %v2250_v55 }
 0x27f   : > { %v1907_v22 = vpop.f32.mrf.mxu1  ;;  %3343 = vmatmul.msk.f32.gmra.mxu0 %vm197_vm1, %v2577_v37 }
 0x280   : > { %v2806_v12 = vadd.f32 %v2736_v39, %v2528_v58  ;;  %3275 = vmatmul.msk.f32.gmra.mxu2 %vm197_vm1, %v2021_v25  ;;  %v1973_v32 = vadd.f32 %v1907_v22, %v4362_v45 }
 0x281   : > { %3309 = vmatmul.msk.f32.gmra.mxu3 %vm197_vm1, %v2299_v40 }
 0x282   : > { %vm2839_vm0 = vcmp.ge.f32.partialorder %v2806_v12, 0.0  ;;  %v2872_v42 = vmul.f32 %v4551_v52, %v2806_v12  ;;  %3242 = vmatmul.msk.f32.gmra.mxu1 %vm197_vm1, %v2576_v33 }
 0x283   : > { %v2183_v56 = vpop.f32.mrf.mxu2 }
 0x284   : > { %v2904_v3 = vsel %vm2839_vm0, %v2806_v12, %v2872_v42  ;;  %v2251_v57 = vadd.f32 %v2183_v56, %v1972_v13  ;;  %v2461_v0 = vpop.f32.mrf.mxu3  ;;  %v2742_v48 = vpop.f32.mrf.mxu0 }
 0x285   : > { %2936 = vst [vmem:[%s4562_s12 + $0x68] sm:$0xff] %v2904_v3 }
 0x286   : > { %v2529_v17 = vadd.f32 %v2461_v0, %v2251_v57 }
 0x287   : > { %v1910_v29 = vpop.f32.mrf.mxu1  ;;  %3344 = vmatmul.msk.f32.gmra.mxu0 %vm197_vm1, %v2578_v46 }
 0x288   : > { %v2807_v28 = vadd.f32 %v2739_v41, %v2529_v17  ;;  %3276 = vmatmul.msk.f32.gmra.mxu2 %vm197_vm1, %v2022_v19  ;;  %v1974_v34 = vadd.f32 %v1910_v29, %v4374_v53 }
 0x289   : > { %3310 = vmatmul.msk.f32.gmra.mxu3 %vm197_vm1, %v2300_v51 }
 0x28a   : > { %vm2840_vm2 = vcmp.ge.f32.partialorder %v2807_v28, 0.0  ;;  %v2873_v27 = vmul.f32 %v4551_v52, %v2807_v28 }
 0x28b   : > { %v2186_v5 = vpop.f32.mrf.mxu2 }
 0x28c   : > { %v2905_v31 = vsel %vm2840_vm2, %v2807_v28, %v2873_v27  ;;  %v2252_v7 = vadd.f32 %v2186_v5, %v1973_v32  ;;  %v2464_v62 = vpop.f32.mrf.mxu3  ;;  %v2745_v21 = vpop.f32.mrf.mxu0 }
 0x28d   : > { %2937 = vst [vmem:[%s4562_s12 + $0x70] sm:$0xff] %v2905_v31 }
 0x28e   : > { %v2530_v16 = vadd.f32 %v2464_v62, %v2252_v7 }
 0x28f   : > { %v1913_v54 = vpop.f32.mrf.mxu1 }
 0x290   : > { %v2808_v26 = vadd.f32 %v2742_v48, %v2530_v16  ;;  %v1975_v20 = vadd.f32 %v1913_v54, %v4386_v60 }
 0x292   : > { %vm2841_vm3 = vcmp.ge.f32.partialorder %v2808_v26, 0.0  ;;  %v2874_v4 = vmul.f32 %v4551_v52, %v2808_v26 }
 0x293   : > { %v2189_v2 = vpop.f32.mrf.mxu2 }
 0x294   : > { %v2906_v45 = vsel %vm2841_vm3, %v2808_v26, %v2874_v4  ;;  %v2253_v39 = vadd.f32 %v2189_v2, %v1974_v34  ;;  %v2467_v33 = vpop.f32.mrf.mxu3  ;;  %v2748_v15 = vpop.f32.mrf.mxu0 }
 0x295   : > { %2938 = vst [vmem:[%s4562_s12 + $0x78] sm:$0xff] %v2906_v45 }
 0x296   : > { %v2531_v43 = vadd.f32 %v2467_v33, %v2253_v39 }
 0x297   : > { %v1916_v47 = vpop.f32.mrf.mxu1 }
 0x298   : > { %v2809_v49 = vadd.f32 %v2745_v21, %v2531_v43  ;;  %v1976_v25 = vadd.f32 %v1916_v47, %v4398_v1 }
 0x29a   : > { %vm2842_vm1 = vcmp.ge.f32.partialorder %v2809_v49, 0.0  ;;  %v2875_v11 = vmul.f32 %v4551_v52, %v2809_v49 }
 0x29b   : > { %v2192_v63 = vpop.f32.mrf.mxu2 }
 0x29c   : > { %v2907_v53 = vsel %vm2842_vm1, %v2809_v49, %v2875_v11  ;;  %v2254_v44 = vadd.f32 %v2192_v63, %v1975_v20  ;;  %v2470_v61 = vpop.f32.mrf.mxu3  ;;  %v2751_v55 = vpop.f32.mrf.mxu0 }
 0x29d   : > { %2939 = vst [vmem:[%s4562_s12 + $0x80] sm:$0xff] %v2907_v53 }
 0x29e   : > { %v2532_v35 = vadd.f32 %v2470_v61, %v2254_v44 }
 0x29f   : > { %v1919_v41 = vpop.f32.mrf.mxu1 }
 0x2a0   : > { %v2810_v37 = vadd.f32 %v2748_v15, %v2532_v35  ;;  %v1977_v57 = vadd.f32 %v1919_v41, %v4410_v9 }
 0x2a2   : > { %vm2843_vm4 = vcmp.ge.f32.partialorder %v2810_v37, 0.0  ;;  %v2876_v58 = vmul.f32 %v4551_v52, %v2810_v37 }
 0x2a3   : > { %v2195_v40 = vpop.f32.mrf.mxu2 }
 0x2a4   : > { %v2908_v60 = vsel %vm2843_vm4, %v2810_v37, %v2876_v58  ;;  %v2255_v22 = vadd.f32 %v2195_v40, %v1976_v25  ;;  %v2473_v12 = vpop.f32.mrf.mxu3  ;;  %v2754_v13 = vpop.f32.mrf.mxu0 }
 0x2a5   : > { %2940 = vst [vmem:[%s4562_s12 + $0x88] sm:$0xff] %v2908_v60 }
 0x2a6   : > { %v2533_v42 = vadd.f32 %v2473_v12, %v2255_v22 }
 0x2a7   : > { %v1922_v56 = vpop.f32.mrf.mxu1 }
 0x2a8   : > { %v2811_v3 = vadd.f32 %v2751_v55, %v2533_v42  ;;  %v1978_v32 = vadd.f32 %v1922_v56, %v4421_v30 }
 0x2aa   : > { %vm2844_vm5 = vcmp.ge.f32.partialorder %v2811_v3, 0.0  ;;  %v2877_v0 = vmul.f32 %v4551_v52, %v2811_v3 }
 0x2ab   : > { %v2198_v48 = vpop.f32.mrf.mxu2 }
 0x2ac   : > { %v2909_v1 = vsel %vm2844_vm5, %v2811_v3, %v2877_v0  ;;  %v2256_v46 = vadd.f32 %v2198_v48, %v1977_v57  ;;  %v2476_v19 = vpop.f32.mrf.mxu3  ;;  %v2757_v17 = vpop.f32.mrf.mxu0 }
 0x2ad   : > { %2941 = vst [vmem:[%s4562_s12 + $0x90] sm:$0xff] %v2909_v1 }
 0x2ae   : > { %v2534_v51 = vadd.f32 %v2476_v19, %v2256_v46 }
 0x2af   : > { %v1925_v29 = vpop.f32.mrf.mxu1 }
 0x2b0   : > { %v2812_v28 = vadd.f32 %v2754_v13, %v2534_v51  ;;  %v1979_v26 = vadd.f32 %v1925_v29, %v4432_v8 }
 0x2b2   : > { %vm2845_vm6 = vcmp.ge.f32.partialorder %v2812_v28, 0.0  ;;  %v2878_v27 = vmul.f32 %v4551_v52, %v2812_v28 }
 0x2b3   : > { %v2201_v5 = vpop.f32.mrf.mxu2 }
 0x2b4   : > { %v2910_v9 = vsel %vm2845_vm6, %v2812_v28, %v2878_v27  ;;  %v2257_v31 = vadd.f32 %v2201_v5, %v1978_v32  ;;  %v2479_v7 = vpop.f32.mrf.mxu3  ;;  %v2760_v62 = vpop.f32.mrf.mxu0 }
 0x2b5   : > { %2942 = vst [vmem:[%s4562_s12 + $0x98] sm:$0xff] %v2910_v9 }
 0x2b6   : > { %v2535_v21 = vadd.f32 %v2479_v7, %v2257_v31 }
 0x2b7   : > { %v1928_v16 = vpop.f32.mrf.mxu1 }
 0x2b8   : > { %v2813_v54 = vadd.f32 %v2757_v17, %v2535_v21  ;;  %v1980_v47 = vadd.f32 %v1928_v16, %v4443_v18 }
 0x2ba   : > { %vm2846_vm7 = vcmp.ge.f32.partialorder %v2813_v54, 0.0  ;;  %v2879_v34 = vmul.f32 %v4551_v52, %v2813_v54 }
 0x2bb   : > { %v2204_v4 = vpop.f32.mrf.mxu2 }
 0x2bc   : > { %v2911_v30 = vsel %vm2846_vm7, %v2813_v54, %v2879_v34  ;;  %v2258_v2 = vadd.f32 %v2204_v4, %v1979_v26  ;;  %v2482_v45 = vpop.f32.mrf.mxu3  ;;  %v2763_v39 = vpop.f32.mrf.mxu0 }
 0x2bd   : > { %2943 = vst [vmem:[%s4562_s12 + $0xa0] sm:$0xff] %v2911_v30 }
 0x2be   : > { %v2536_v33 = vadd.f32 %v2482_v45, %v2258_v2 }
 0x2bf   : > { %v1931_v15 = vpop.f32.mrf.mxu1 }
 0x2c0   : > { %v2814_v43 = vadd.f32 %v2760_v62, %v2536_v33  ;;  %v1981_v35 = vadd.f32 %v1931_v15, %v4454_v50 }
 0x2c2   : > { %vm2847_vm8 = vcmp.ge.f32.partialorder %v2814_v43, 0.0  ;;  %v2880_v49 = vmul.f32 %v4551_v52, %v2814_v43 }
 0x2c3   : > { %v2207_v20 = vpop.f32.mrf.mxu2 }
 0x2c4   : > { %v2912_v8 = vsel %vm2847_vm8, %v2814_v43, %v2880_v49  ;;  %v2259_v11 = vadd.f32 %v2207_v20, %v1980_v47  ;;  %v2485_v63 = vpop.f32.mrf.mxu3  ;;  %v2766_v53 = vpop.f32.mrf.mxu0 }
 0x2c5   : > { %2944 = vst [vmem:[%s4562_s12 + $0xa8] sm:$0xff] %v2912_v8 }
 0x2c6   : > { %v2537_v44 = vadd.f32 %v2485_v63, %v2259_v11 }
 0x2c7   : > { %v1934_v61 = vpop.f32.mrf.mxu1 }
 0x2c8   : > { %v2815_v55 = vadd.f32 %v2763_v39, %v2537_v44  ;;  %v1982_v13 = vadd.f32 %v1934_v61, %v4465_v24 }
 0x2ca   : > { %vm2848_vm9 = vcmp.ge.f32.partialorder %v2815_v55, 0.0  ;;  %v2881_v41 = vmul.f32 %v4551_v52, %v2815_v55 }
 0x2cb   : > { %v2210_v37 = vpop.f32.mrf.mxu2 }
 0x2cc   : > { %v2913_v18 = vsel %vm2848_vm9, %v2815_v55, %v2881_v41  ;;  %v2260_v25 = vadd.f32 %v2210_v37, %v1981_v35  ;;  %v2488_v58 = vpop.f32.mrf.mxu3  ;;  %v2769_v40 = vpop.f32.mrf.mxu0 }
 0x2cd   : > { %2945 = vst [vmem:[%s4562_s12 + $0xb0] sm:$0xff] %v2913_v18 }
 0x2ce   : > { %v2538_v60 = vadd.f32 %v2488_v58, %v2260_v25 }
 0x2cf   : > { %v1937_v22 = vpop.f32.mrf.mxu1 }
 0x2d0   : > { %v2816_v12 = vadd.f32 %v2766_v53, %v2538_v60  ;;  %v1983_v19 = vadd.f32 %v1937_v22, %v4476_v59 }
 0x2d2   : > { %vm2849_vm10 = vcmp.ge.f32.partialorder %v2816_v12, 0.0  ;;  %v2882_v42 = vmul.f32 %v4551_v52, %v2816_v12 }
 0x2d3   : > { %v2213_v56 = vpop.f32.mrf.mxu2 }
 0x2d4   : > { %v2914_v50 = vsel %vm2849_vm10, %v2816_v12, %v2882_v42  ;;  %v2261_v3 = vadd.f32 %v2213_v56, %v1982_v13  ;;  %v2491_v57 = vpop.f32.mrf.mxu3  ;;  %v2772_v0 = vpop.f32.mrf.mxu0 }
 0x2d5   : > { %2946 = vst [vmem:[%s4562_s12 + $0xb8] sm:$0xff] %v2914_v50 }
 0x2d6   : > { %v2539_v48 = vadd.f32 %v2491_v57, %v2261_v3 }
 0x2d7   : > { %v1940_v1 = vpop.f32.mrf.mxu1 }
 0x2d8   : > { %v2817_v46 = vadd.f32 %v2769_v40, %v2539_v48  ;;  %v1984_v31 = vadd.f32 %v1940_v1, %v4487_v6 }
 0x2da   : > { %vm2850_vm11 = vcmp.ge.f32.partialorder %v2817_v46, 0.0  ;;  %v2883_v17 = vmul.f32 %v4551_v52, %v2817_v46 }
 0x2db   : > { %v2216_v51 = vpop.f32.mrf.mxu2 }
 0x2dc   : > { %v2915_v24 = vsel %vm2850_vm11, %v2817_v46, %v2883_v17  ;;  %v2262_v29 = vadd.f32 %v2216_v51, %v1983_v19  ;;  %v2494_v28 = vpop.f32.mrf.mxu3  ;;  %v2775_v32 = vpop.f32.mrf.mxu0 }
 0x2dd   : > { %2947 = vst [vmem:[%s4562_s12 + $0xc0] sm:$0xff] %v2915_v24 }
 0x2de   : > { %v2540_v27 = vadd.f32 %v2494_v28, %v2262_v29 }
 0x2df   : > { %v1943_v5 = vpop.f32.mrf.mxu1 }
 0x2e0   : > { %v2818_v9 = vadd.f32 %v2772_v0, %v2540_v27  ;;  %v1985_v30 = vadd.f32 %v1943_v5, %v4498_v23 }
 0x2e2   : > { %vm2851_vm12 = vcmp.ge.f32.partialorder %v2818_v9, 0.0  ;;  %v2884_v7 = vmul.f32 %v4551_v52, %v2818_v9 }
 0x2e3   : > { %v2219_v62 = vpop.f32.mrf.mxu2 }
 0x2e4   : > { %v2916_v59 = vsel %vm2851_vm12, %v2818_v9, %v2884_v7  ;;  %v2263_v21 = vadd.f32 %v2219_v62, %v1984_v31  ;;  %v2497_v16 = vpop.f32.mrf.mxu3  ;;  %v2778_v54 = vpop.f32.mrf.mxu0 }
 0x2e5   : > { %2948 = vst [vmem:[%s4562_s12 + $0xc8] sm:$0xff] %v2916_v59 }
 0x2e6   : > { %v2541_v26 = vadd.f32 %v2497_v16, %v2263_v21 }
 0x2e7   : > { %v1946_v4 = vpop.f32.mrf.mxu1 }
 0x2e8   : > { %v2819_v34 = vadd.f32 %v2775_v32, %v2541_v26  ;;  %v1986_v49 = vadd.f32 %v1946_v4, %v4509_v14 }
 0x2ea   : > { %vm2852_vm13 = vcmp.ge.f32.partialorder %v2819_v34, 0.0  ;;  %v2885_v2 = vmul.f32 %v4551_v52, %v2819_v34 }
 0x2eb   : > { %v2222_v45 = vpop.f32.mrf.mxu2 }
 0x2ec   : > { %v2917_v6 = vsel %vm2852_vm13, %v2819_v34, %v2885_v2  ;;  %v2264_v39 = vadd.f32 %v2222_v45, %v1985_v30  ;;  %v2500_v33 = vpop.f32.mrf.mxu3  ;;  %v2781_v43 = vpop.f32.mrf.mxu0 }
 0x2ed   : > { %2949 = vst [vmem:[%s4562_s12 + $0xd0] sm:$0xff] %v2917_v6 }
 0x2ee   : > { %v2542_v15 = vadd.f32 %v2500_v33, %v2264_v39 }
 0x2ef   : > { %v1949_v23 = vpop.f32.mrf.mxu1 }
 0x2f0   : > { %v2820_v47 = vadd.f32 %v2778_v54, %v2542_v15  ;;  %v1987_v35 = vadd.f32 %v1949_v23, %v4520_v10 }
 0x2f2   : > { %vm2853_vm14 = vcmp.ge.f32.partialorder %v2820_v47, 0.0  ;;  %v2886_v20 = vmul.f32 %v4551_v52, %v2820_v47 }
 0x2f3   : > { %v2225_v8 = vpop.f32.mrf.mxu2 }
 0x2f4   : > { %v2918_v11 = vsel %vm2853_vm14, %v2820_v47, %v2886_v20  ;;  %v2265_v63 = vadd.f32 %v2225_v8, %v1986_v49  ;;  %v2503_v53 = vpop.f32.mrf.mxu3  ;;  %v2784_v55 = vpop.f32.mrf.mxu0 }
 0x2f5   : > { %2950 = vst [vmem:[%s4562_s12 + $0xd8] sm:$0xff] %v2918_v11 }
 0x2f6   : > { %v2543_v44 = vadd.f32 %v2503_v53, %v2265_v63 }
 0x2f7   : > { %v1952_v58 = vpop.f32.mrf.mxu1 }
 0x2f8   : > { %v2821_v61 = vadd.f32 %v2781_v43, %v2543_v44  ;;  %v1988_v22 = vadd.f32 %v1952_v58, %v4531_v38 }
 0x2fa   : > { %vm2854_vm15 = vcmp.ge.f32.partialorder %v2821_v61, 0.0  ;;  %v2887_v41 = vmul.f32 %v4551_v52, %v2821_v61 }
 0x2fb   : > { %v2228_v37 = vpop.f32.mrf.mxu2 }
 0x2fc   : > { %v2919_v14 = vsel %vm2854_vm15, %v2821_v61, %v2887_v41  ;;  %v2266_v18 = vadd.f32 %v2228_v37, %v1987_v35  ;;  %v2506_v25 = vpop.f32.mrf.mxu3  ;;  %v2787_v10 = vpop.f32.mrf.mxu0 }
 0x2fd   : > { %2951 = vst [vmem:[%s4562_s12 + $0xe0] sm:$0xff] %v2919_v14 }
 0x2fe   : > { %v2544_v40 = vadd.f32 %v2506_v25, %v2266_v18 }
 0x2ff   : > { %v1955_v57 = vpop.f32.mrf.mxu1 }
 0x300   : > { %v2822_v60 = vadd.f32 %v2784_v55, %v2544_v40  ;;  %v1989_v48 = vadd.f32 %v1955_v57, %v4540_v36 }
 0x302   : > { %vm2855_vm0 = vcmp.ge.f32.partialorder %v2822_v60, 0.0  ;;  %v2888_v12 = vmul.f32 %v4551_v52, %v2822_v60 }
 0x303   : > { %v2231_v13 = vpop.f32.mrf.mxu2 }
 0x304   : > { %v2920_v42 = vsel %vm2855_vm0, %v2822_v60, %v2888_v12  ;;  %v2267_v56 = vadd.f32 %v2231_v13, %v1988_v22  ;;  %v2509_v50 = vpop.f32.mrf.mxu3  ;;  %v2790_v51 = vpop.f32.mrf.mxu0 }
 0x305   : > { %2952 = vst [vmem:[%s4562_s12 + $0xe8] sm:$0xff] %v2920_v42 }
 0x306   : > { %v2545_v3 = vadd.f32 %v2509_v50, %v2267_v56 }
 0x308   : > { %v2823_v0 = vadd.f32 %v2787_v10, %v2545_v3 }
 0x30a   : > { %vm2856_vm2 = vcmp.ge.f32.partialorder %v2823_v0, 0.0  ;;  %v2889_v38 = vmul.f32 %v4551_v52, %v2823_v0 }
 0x30b   : > { %v2234_v1 = vpop.f32.mrf.mxu2 }
 0x30c   : > { %v2921_v46 = vsel %vm2856_vm2, %v2823_v0, %v2889_v38  ;;  %v2268_v19 = vadd.f32 %v2234_v1, %v1989_v48  ;;  %v2512_v17 = vpop.f32.mrf.mxu3 }
 0x30d   : > { %2953 = vst [vmem:[%s4562_s12 + $0xf0] sm:$0xff] %v2921_v46 }
 0x30e   : > { %v2546_v24 = vadd.f32 %v2512_v17, %v2268_v19 }
 0x310   : > { %v2824_v36 = vadd.f32 %v2790_v51, %v2546_v24 }
 0x312   : > { %vm2857_vm3 = vcmp.ge.f32.partialorder %v2824_v36, 0.0  ;;  %v2890_v29 = vmul.f32 %v4551_v52, %v2824_v36 }
 0x314   : > { %v2922_v28 = vsel %vm2857_vm3, %v2824_v36, %v2890_v29 }
 0x315   : > { %2954 = vst [vmem:[%s4562_s12 + $0xf8] sm:$0xff] %v2922_v28 }
 0x316   : > { %3425 = shalt.err (!%p3422_p3)
}
 0x317   : > { %s3463_s9 = smov 128   ;;  %s3464_s8 = smov 8  }
 0x318   : > { %3355 = dma.vmem_to_hbm [thread:$0]  (%p3531_p5), %s2969_s0, 4096, %s2971_s21, %s2956_s23, %s3463_s9, %s3463_s9, %s3464_s8  }
 0x319 PF: > { %p3361_p4 = scmp.ge.s32.totalorder %s3460_s20, 2  ;;  %s2985_s10 = sand.u32 1, %s3448_s17  }
 0x31a   : > { %s2986_s11 = scalar_lea.sflag [#allocation5], %s2985_s10 }
 0x31b   : > { %p3358_p7 = pnand %p3361_p4, %p3535_p6 }
 0x31d   : > { %p3359_p8 = pneg %p3358_p7 }
 0x31f   : > { %3443 = dma.done.wait (%p3359_p8), %s2986_s11, 4096  }
 0x320   : > { %3445 = vsyncadd (%p3359_p8), %s2986_s11, 4294963200  ;;  %p15_p9 = scmp.ge.s32.totalorder %s3518_s22, 4   ;;  %s4893_s17 = smov %s3452_s18 }
 0x321   : > { %s4894_s18 = smov %s3456_s19  ;;  %s4895_s19 = smov %s3529_s25 }
 0x322   : > { %s4896_s20 = smov %s3518_s22  ;;  %17 = sbr.rel (!%p15_p9) target bundleno = 5 (0x5), region = 81 }
 0x327   :  { %2992 = vsyncpa [#allocation5], 1 }
 0x328   :  { %2994 = vsyncpa [#allocation5 + $0x1], 1 }

</bundles_post_ra>
